<compile_context>
chip_gen: v6e
topology: v6e:2x2x1
jax: 0.10.0
libtpu: 0.0.40
codegen_flags: <defaults>
</compile_context>

<pallas_src>
import jax
import jax.numpy as jnp
from jax.experimental import pallas as pl
from jax.experimental.pallas import tpu as pltpu


def _bigru_recurrence_kernel(gi_ref, w_ref, bhn_ref, out_ref, h_ref):
    """Recurrent part of one bidirectional GRU layer (both directions fused).

    Grid axis 0 = time chunk ("arbitrary"); hidden state carried in h_ref.

    gi_ref : (T_c, B_pad, 6H)  precomputed input projections in WORK order
                               (backward direction already time-reversed),
                               gate-major layout [r_f r_b | z_f z_b | n_f n_b]
                               with b_ih and b_hh[r], b_hh[z] folded in.
    w_ref  : (2H, 6H)          block-diagonal gate-major hidden weights.
    bhn_ref: (1, 2H)           hidden bias of the n gate [fwd | bwd].
    out_ref: (T_c, B_pad, 2H)  packed per-step hidden states in WORK order.
    h_ref  : (B_pad, 2H)       VMEM scratch — hidden carry across chunks.
    """
    t_chunk, b_pad, _ = gi_ref.shape
    h2 = out_ref.shape[-1]                                # 2H

    @pl.when(pl.program_id(0) == 0)
    def _():
        h_ref[...] = jnp.zeros_like(h_ref)

    # Loop invariants hoisted: weights in vregs, broadcast n-bias.
    w = w_ref[...]                                        # (2H, 6H)
    bhn = jnp.broadcast_to(bhn_ref[...], (b_pad, h2))     # (B_pad, 2H)

    h = h_ref[...]                                        # (B_pad, 2H)
    # Static (Python) time indices: no scalar address work on the serial
    # critical path.  t_chunk is capped (<=32) by the wrapper, so this unroll
    # stays small; longer sequences stream via the grid axis.
    for t in range(t_chunk):
        gi = gi_ref[t]                                    # (B_pad, 6H) static idx
        gh = jnp.dot(h, w, preferred_element_type=jnp.float32)    # (B_pad, 6H)
        r = jax.nn.sigmoid(gi[:, 0:h2] + gh[:, 0:h2])
        z = jax.nn.sigmoid(gi[:, h2:2 * h2] + gh[:, h2:2 * h2])
        n = jnp.tanh(gi[:, 2 * h2:] + r * (gh[:, 2 * h2:] + bhn))
        h = (1.0 - z) * n + z * h
        out_ref[t] = h.astype(out_ref.dtype)              # static idx, 2H-wide store
    h_ref[...] = h


def _pick_time_chunk(seq_len, max_chunk=32):
    """Largest divisor of seq_len that is <= max_chunk (caps the static unroll)."""
    for c in range(min(seq_len, max_chunk), 0, -1):
        if seq_len % c == 0:
            return c
    return 1


def gru_layer(x_tm, wih, whh, bi, bh):
    """One bidirectional GRU layer (single pallas_call, directions fused).

    x_tm: (S, B_pad, D) time-major, batch already padded to a multiple of 8.
    wih : (2, D, 3H), whh: (2, H, 3H), bi/bh: (2, 1, 3H)  — gate order [r|z|n].
    Returns (S, B_pad, 2H) packed hidden states in WORK order:
      [..., :H]  = forward  h at time t
      [..., H:]  = backward h at time S-1-t
    """
    S, B_pad, _ = x_tm.shape
    H = whh.shape[1]

    # --- Hoisted input projection (one big parallel matmul, default precision).
    gi = jnp.einsum('sbd,kdg->ksbg', x_tm, wih)            # (2, S, B_pad, 3H)
    bh_rz = bh.at[..., 2 * H:].set(0.0)                    # fold b_hh[r], b_hh[z]
    gi = gi + (bi + bh_rz)[:, None, :, :]

    # --- Work-order, gate-major, direction-fused layout (S, B_pad, 6H).
    gi_f = gi[0].reshape(S, B_pad, 3, H)                   # forward, time order
    gi_b = gi[1][::-1].reshape(S, B_pad, 3, H)             # backward, reversed time
    gi_fused = jnp.stack([gi_f, gi_b], axis=3).reshape(S, B_pad, 6 * H)

    # --- Block-diagonal gate-major hidden weights (2H, 6H).
    whh_g = whh.reshape(2, H, 3, H)                        # (dir, H, gate, H)
    w_bd = jnp.zeros((2, H, 3, 2, H), whh.dtype)
    w_bd = w_bd.at[0, :, :, 0, :].set(whh_g[0])            # forward block
    w_bd = w_bd.at[1, :, :, 1, :].set(whh_g[1])            # backward block
    w_bd = w_bd.reshape(2 * H, 6 * H)

    # --- Fused n-gate hidden bias (1, 2H): [fwd | bwd].
    bhn = jnp.concatenate([bh[0][:, 2 * H:], bh[1][:, 2 * H:]], axis=-1)

    t_chunk = _pick_time_chunk(S)
    num_chunks = S // t_chunk

    return pl.pallas_call(
        _bigru_recurrence_kernel,
        out_shape=jax.ShapeDtypeStruct((S, B_pad, 2 * H), jnp.float32),
        grid_spec=pltpu.PrefetchScalarGridSpec(
            num_scalar_prefetch=0,
            grid=(num_chunks,),                            # time chunks, sequential
            in_specs=[
                pl.BlockSpec((t_chunk, B_pad, 6 * H), lambda c: (c, 0, 0)),
                pl.BlockSpec((2 * H, 6 * H), lambda c: (0, 0)),
                pl.BlockSpec((1, 2 * H), lambda c: (0, 0)),
            ],
            out_specs=pl.BlockSpec((t_chunk, B_pad, 2 * H), lambda c: (c, 0, 0)),
            scratch_shapes=[pltpu.VMEM((B_pad, 2 * H), jnp.float32)],
        ),
        compiler_params=pltpu.CompilerParams(
            dimension_semantics=("arbitrary",)),
    )(gi_fused, w_bd, bhn)


def init_gru_params(key, embedding_dim, hidden_dim, num_layers):
    """Deterministic init matching nn.GRU shapes (bidirectional), fused layout.

    Per layer: wih (2, D_in, 3H), whh (2, H, 3H), bi/bh (2, 1, 3H), H = hidden_dim // 2.
    Gate order along the last axis is [r | z | n] (PyTorch nn.GRU convention).
    """
    H = hidden_dim // 2
    bound = 1.0 / (H ** 0.5)
    params = []
    k = key
    for layer in range(num_layers):
        d_in = embedding_dim if layer == 0 else hidden_dim
        k, k1, k2, k3, k4 = jax.random.split(k, 5)
        wih = jax.random.uniform(k1, (2, d_in, 3 * H), jnp.float32, -bound, bound)
        whh = jax.random.uniform(k2, (2, H, 3 * H), jnp.float32, -bound, bound)
        bi = jax.random.uniform(k3, (2, 1, 3 * H), jnp.float32, -bound, bound)
        bh = jax.random.uniform(k4, (2, 1, 3 * H), jnp.float32, -bound, bound)
        params.append((wih, whh, bi, bh))
    return params


def rnn_forward(x, params):
    """Forward pass of the Rnn module (GRU, bidirectional, batch_first).

    x: (B, S, D) -> (output (B, S, hidden_dim), h_n (2*num_layers, B, hidden_dim//2))
    """
    B, S, _ = x.shape
    H = params[0][1].shape[1]
    B_pad = max(8, ((B + 7) // 8) * 8)                     # sublane-dense batch

    x_tm = jnp.transpose(x, (1, 0, 2))                     # (S, B, D)
    x_tm = jnp.pad(x_tm, ((0, 0), (0, B_pad - B), (0, 0)))

    h_n_list = []
    inp = x_tm
    for (wih, whh, bi, bh) in params:
        out_work = gru_layer(inp, wih, whh, bi, bh)        # (S, B_pad, 2H) work order
        fwd = out_work[..., :H]                            # fwd h, original time order
        bwd = out_work[::-1, :, H:]                        # bwd h, un-reversed
        h_n_list.append(out_work[-1, :B, :H])              # fwd final hidden (t=S-1)
        h_n_list.append(out_work[-1, :B, H:])              # bwd final hidden (t=0)
        inp = jnp.concatenate([fwd, bwd], axis=-1)         # (S, B_pad, 2H)
    output = jnp.transpose(inp[:, :B, :], (1, 0, 2))       # (B, S, hidden_dim)
    h_n = jnp.stack(h_n_list, axis=0)                      # (2*num_layers, B, H)
    return output, h_n


# ---- pure-JAX reference (lax.scan) for correctness checking ----
def _gru_direction_ref(x_tm, wih, whh, bi, bh):
    B = x_tm.shape[1]
    H = whh.shape[0]

    def step(h, x_t):
        gi = jnp.dot(x_t, wih) + bi
        gh = jnp.dot(h, whh) + bh
        r = jax.nn.sigmoid(gi[:, :H] + gh[:, :H])
        z = jax.nn.sigmoid(gi[:, H:2 * H] + gh[:, H:2 * H])
        n = jnp.tanh(gi[:, 2 * H:] + r * gh[:, 2 * H:])
        h_new = (1.0 - z) * n + z * h
        return h_new, h_new

    h0 = jnp.zeros((B, H), jnp.float32)
    _, ys = jax.lax.scan(step, h0, x_tm)
    return ys


def rnn_forward_ref(x, params):
    x_tm = jnp.transpose(x, (1, 0, 2))
    h_n_list = []
    inp = x_tm
    for (wih, whh, bi, bh) in params:
        out_f = _gru_direction_ref(inp, wih[0], whh[0], bi[0], bh[0])
        out_b_rev = _gru_direction_ref(inp[::-1], wih[1], whh[1], bi[1], bh[1])
        out_b = out_b_rev[::-1]
        h_n_list.append(out_f[-1])
        h_n_list.append(out_b_rev[-1])
        inp = jnp.concatenate([out_f, out_b], axis=-1)
    return jnp.transpose(inp, (1, 0, 2)), jnp.stack(h_n_list, axis=0)


if __name__ == "__main__":
    # Shapes implied by the module's forward:
    # batch=2, seq=8, embedding_dim=32, hidden_dim=32, num_layers=2, cell_type='GRU'
    B, S, EMB, HID, L = 2, 8, 32, 32, 2
    key = jax.random.PRNGKey(0)
    kx, kp = jax.random.split(key)
    x = jax.random.normal(kx, (B, S, EMB), jnp.float32)
    params = init_gru_params(kp, EMB, HID, L)

    out, h_n = jax.jit(rnn_forward)(x, params)
    jax.block_until_ready((out, h_n))

    ref_out, ref_h = rnn_forward_ref(x, params)
    assert out.shape == (B, S, HID) and h_n.shape == (2 * L, B, HID // 2)
    # Default MXU matmul precision on both sides -> modest tolerance.
    assert jnp.allclose(out, ref_out, atol=5e-3, rtol=5e-3), \
        float(jnp.abs(out - ref_out).max())
    assert jnp.allclose(h_n, ref_h, atol=5e-3, rtol=5e-3), \
        float(jnp.abs(h_n - ref_h).max())

    print("KERNEL_OK")
</pallas_src>

<mosaic_0001>
module attributes {stable_mosaic.version = 11 : i64} {
  func.func @_bigru_recurrence_kernel(%arg0: i32, %arg1: memref<8x8x96xf32, #tpu.memory_space<vmem>>, %arg2: memref<32x96xf32, #tpu.memory_space<vmem>>, %arg3: memref<1x32xf32, #tpu.memory_space<vmem>>, %arg4: memref<8x8x32xf32, #tpu.memory_space<vmem>>, %arg5: memref<8x32xf32, #tpu.memory_space<vmem>>) attributes {dimension_semantics = [#tpu.dimension_semantics<arbitrary>], iteration_bounds = array<i64: 1>, scalar_prefetch = 0 : i64, scratch_operands = 1 : i64, tpu.core_type = #tpu.core_type<tc>, window_params = [{transform_indices = @transform_0, window_bounds = array<i64: 8, 8, 96>}, {pipeline_mode = #tpu.pipeline_mode<synchronous>, transform_indices = @transform_1, window_bounds = array<i64: 32, 96>}, {pipeline_mode = #tpu.pipeline_mode<synchronous>, transform_indices = @transform_2, window_bounds = array<i64: 1, 32>}, {transform_indices = @transform_3, window_bounds = array<i64: 8, 8, 32>}]} {
    %c0_i32 = arith.constant 0 : i32
    %0 = arith.cmpi eq, %arg0, %c0_i32 : i32
    %1 = arith.extui %0 : i1 to i32
    %c0_i32_0 = arith.constant 0 : i32
    %2 = arith.cmpi ne, %1, %c0_i32_0 : i32
    scf.if %2 {
      %cst_80 = arith.constant 0.000000e+00 : f32
      %273 = vector.broadcast %cst_80 : f32 to vector<8x32xf32>
      %c0_81 = arith.constant 0 : index
      %c0_82 = arith.constant 0 : index
      %274 = vector.load %arg5[%c0_81, %c0_82] : memref<8x32xf32, #tpu.memory_space<vmem>>, vector<8x32xf32>
      tpu.vector_store %arg5[%c0_81, %c0_82], %273 {strides = array<i32>} : memref<8x32xf32, #tpu.memory_space<vmem>>, vector<8x32xf32>,
    } else {
    }
    %c0 = arith.constant 0 : index
    %c0_1 = arith.constant 0 : index
    %3 = vector.load %arg2[%c0, %c0_1] : memref<32x96xf32, #tpu.memory_space<vmem>>, vector<32x96xf32>
    %c0_2 = arith.constant 0 : index
    %c0_3 = arith.constant 0 : index
    %4 = vector.load %arg3[%c0_2, %c0_3] : memref<1x32xf32, #tpu.memory_space<vmem>>, vector<1x32xf32>
    %5 = vector.shape_cast %4 : vector<1x32xf32> to vector<1x32xf32>
    %6 = vector.broadcast %5 : vector<1x32xf32> to vector<8x32xf32>
    %c0_4 = arith.constant 0 : index
    %c0_5 = arith.constant 0 : index
    %7 = vector.load %arg5[%c0_4, %c0_5] : memref<8x32xf32, #tpu.memory_space<vmem>>, vector<8x32xf32>
    %c0_6 = arith.constant 0 : index
    %c0_7 = arith.constant 0 : index
    %c0_8 = arith.constant 0 : index
    %8 = vector.load %arg1[%c0_6, %c0_7, %c0_8] : memref<8x8x96xf32, #tpu.memory_space<vmem>>, vector<1x8x96xf32>
    %9 = vector.shape_cast %8 : vector<1x8x96xf32> to vector<8x96xf32>
    %cst = arith.constant dense<0.000000e+00> : vector<8x96xf32>
    %10 = tpu.matmul %7, %3, %cst {dimension_numbers = #tpu.dot_dimension_numbers<[1], [0], [0], [1], [0, 0, 1, 1], [], []>} : vector<8x32xf32>, vector<32x96xf32>, vector<8x96xf32> -> vector<8x96xf32>
    %11 = vector.extract_strided_slice %9 {offsets = [0, 0], sizes = [8, 32], strides = [1, 1]} : vector<8x96xf32> to vector<8x32xf32>
    %12 = vector.extract_strided_slice %10 {offsets = [0, 0], sizes = [8, 32], strides = [1, 1]} : vector<8x96xf32> to vector<8x32xf32>
    %13 = arith.addf %11, %12 : vector<8x32xf32>
    %14 = arith.negf %13 : vector<8x32xf32>
    %15 = math.exp %14 : vector<8x32xf32>
    %cst_9 = arith.constant 1.000000e+00 : f32
    %16 = vector.broadcast %cst_9 : f32 to vector<8x32xf32>
    %17 = arith.addf %16, %15 : vector<8x32xf32>
    %18 = arith.divf %16, %17 : vector<8x32xf32>
    %19 = vector.extract_strided_slice %9 {offsets = [0, 32], sizes = [8, 32], strides = [1, 1]} : vector<8x96xf32> to vector<8x32xf32>
    %20 = vector.extract_strided_slice %10 {offsets = [0, 32], sizes = [8, 32], strides = [1, 1]} : vector<8x96xf32> to vector<8x32xf32>
    %21 = arith.addf %19, %20 : vector<8x32xf32>
    %22 = arith.negf %21 : vector<8x32xf32>
    %23 = math.exp %22 : vector<8x32xf32>
    %cst_10 = arith.constant 1.000000e+00 : f32
    %24 = vector.broadcast %cst_10 : f32 to vector<8x32xf32>
    %25 = arith.addf %24, %23 : vector<8x32xf32>
    %26 = arith.divf %24, %25 : vector<8x32xf32>
    %27 = vector.extract_strided_slice %9 {offsets = [0, 64], sizes = [8, 32], strides = [1, 1]} : vector<8x96xf32> to vector<8x32xf32>
    %28 = vector.extract_strided_slice %10 {offsets = [0, 64], sizes = [8, 32], strides = [1, 1]} : vector<8x96xf32> to vector<8x32xf32>
    %29 = arith.addf %28, %6 : vector<8x32xf32>
    %30 = arith.mulf %18, %29 : vector<8x32xf32>
    %31 = arith.addf %27, %30 : vector<8x32xf32>
    %32 = math.tanh %31 : vector<8x32xf32>
    %cst_11 = arith.constant 1.000000e+00 : f32
    %33 = vector.broadcast %cst_11 : f32 to vector<8x32xf32>
    %34 = arith.subf %33, %26 : vector<8x32xf32>
    %35 = arith.mulf %34, %32 : vector<8x32xf32>
    %36 = arith.mulf %26, %7 : vector<8x32xf32>
    %37 = arith.addf %35, %36 : vector<8x32xf32>
    %c0_12 = arith.constant 0 : index
    %c0_13 = arith.constant 0 : index
    %c0_14 = arith.constant 0 : index
    %38 = vector.load %arg4[%c0_12, %c0_13, %c0_14] : memref<8x8x32xf32, #tpu.memory_space<vmem>>, vector<1x8x32xf32>
    %39 = vector.shape_cast %38 : vector<1x8x32xf32> to vector<8x32xf32>
    %40 = vector.shape_cast %37 : vector<8x32xf32> to vector<1x8x32xf32>
    tpu.vector_store %arg4[%c0_12, %c0_13, %c0_14], %40 {strides = array<i32>} : memref<8x8x32xf32, #tpu.memory_space<vmem>>, vector<1x8x32xf32>,
    %c1 = arith.constant 1 : index
    %c0_15 = arith.constant 0 : index
    %c0_16 = arith.constant 0 : index
    %41 = vector.load %arg1[%c1, %c0_15, %c0_16] : memref<8x8x96xf32, #tpu.memory_space<vmem>>, vector<1x8x96xf32>
    %42 = vector.shape_cast %41 : vector<1x8x96xf32> to vector<8x96xf32>
    %cst_17 = arith.constant dense<0.000000e+00> : vector<8x96xf32>
    %43 = tpu.matmul %37, %3, %cst_17 {dimension_numbers = #tpu.dot_dimension_numbers<[1], [0], [0], [1], [0, 0, 1, 1], [], []>} : vector<8x32xf32>, vector<32x96xf32>, vector<8x96xf32> -> vector<8x96xf32>
    %44 = vector.extract_strided_slice %42 {offsets = [0, 0], sizes = [8, 32], strides = [1, 1]} : vector<8x96xf32> to vector<8x32xf32>
    %45 = vector.extract_strided_slice %43 {offsets = [0, 0], sizes = [8, 32], strides = [1, 1]} : vector<8x96xf32> to vector<8x32xf32>
    %46 = arith.addf %44, %45 : vector<8x32xf32>
    %47 = arith.negf %46 : vector<8x32xf32>
    %48 = math.exp %47 : vector<8x32xf32>
    %cst_18 = arith.constant 1.000000e+00 : f32
    %49 = vector.broadcast %cst_18 : f32 to vector<8x32xf32>
    %50 = arith.addf %49, %48 : vector<8x32xf32>
    %51 = arith.divf %49, %50 : vector<8x32xf32>
    %52 = vector.extract_strided_slice %42 {offsets = [0, 32], sizes = [8, 32], strides = [1, 1]} : vector<8x96xf32> to vector<8x32xf32>
    %53 = vector.extract_strided_slice %43 {offsets = [0, 32], sizes = [8, 32], strides = [1, 1]} : vector<8x96xf32> to vector<8x32xf32>
    %54 = arith.addf %52, %53 : vector<8x32xf32>
    %55 = arith.negf %54 : vector<8x32xf32>
    %56 = math.exp %55 : vector<8x32xf32>
    %cst_19 = arith.constant 1.000000e+00 : f32
    %57 = vector.broadcast %cst_19 : f32 to vector<8x32xf32>
    %58 = arith.addf %57, %56 : vector<8x32xf32>
    %59 = arith.divf %57, %58 : vector<8x32xf32>
    %60 = vector.extract_strided_slice %42 {offsets = [0, 64], sizes = [8, 32], strides = [1, 1]} : vector<8x96xf32> to vector<8x32xf32>
    %61 = vector.extract_strided_slice %43 {offsets = [0, 64], sizes = [8, 32], strides = [1, 1]} : vector<8x96xf32> to vector<8x32xf32>
    %62 = arith.addf %61, %6 : vector<8x32xf32>
    %63 = arith.mulf %51, %62 : vector<8x32xf32>
    %64 = arith.addf %60, %63 : vector<8x32xf32>
    %65 = math.tanh %64 : vector<8x32xf32>
    %cst_20 = arith.constant 1.000000e+00 : f32
    %66 = vector.broadcast %cst_20 : f32 to vector<8x32xf32>
    %67 = arith.subf %66, %59 : vector<8x32xf32>
    %68 = arith.mulf %67, %65 : vector<8x32xf32>
    %69 = arith.mulf %59, %37 : vector<8x32xf32>
    %70 = arith.addf %68, %69 : vector<8x32xf32>
    %c1_21 = arith.constant 1 : index
    %c0_22 = arith.constant 0 : index
    %c0_23 = arith.constant 0 : index
    %71 = vector.load %arg4[%c1_21, %c0_22, %c0_23] : memref<8x8x32xf32, #tpu.memory_space<vmem>>, vector<1x8x32xf32>
    %72 = vector.shape_cast %71 : vector<1x8x32xf32> to vector<8x32xf32>
    %73 = vector.shape_cast %70 : vector<8x32xf32> to vector<1x8x32xf32>
    tpu.vector_store %arg4[%c1_21, %c0_22, %c0_23], %73 {strides = array<i32>} : memref<8x8x32xf32, #tpu.memory_space<vmem>>, vector<1x8x32xf32>,
    %c2 = arith.constant 2 : index
    %c0_24 = arith.constant 0 : index
    %c0_25 = arith.constant 0 : index
    %74 = vector.load %arg1[%c2, %c0_24, %c0_25] : memref<8x8x96xf32, #tpu.memory_space<vmem>>, vector<1x8x96xf32>
    %75 = vector.shape_cast %74 : vector<1x8x96xf32> to vector<8x96xf32>
    %cst_26 = arith.constant dense<0.000000e+00> : vector<8x96xf32>
    %76 = tpu.matmul %70, %3, %cst_26 {dimension_numbers = #tpu.dot_dimension_numbers<[1], [0], [0], [1], [0, 0, 1, 1], [], []>} : vector<8x32xf32>, vector<32x96xf32>, vector<8x96xf32> -> vector<8x96xf32>
    %77 = vector.extract_strided_slice %75 {offsets = [0, 0], sizes = [8, 32], strides = [1, 1]} : vector<8x96xf32> to vector<8x32xf32>
    %78 = vector.extract_strided_slice %76 {offsets = [0, 0], sizes = [8, 32], strides = [1, 1]} : vector<8x96xf32> to vector<8x32xf32>
    %79 = arith.addf %77, %78 : vector<8x32xf32>
    %80 = arith.negf %79 : vector<8x32xf32>
    %81 = math.exp %80 : vector<8x32xf32>
    %cst_27 = arith.constant 1.000000e+00 : f32
    %82 = vector.broadcast %cst_27 : f32 to vector<8x32xf32>
    %83 = arith.addf %82, %81 : vector<8x32xf32>
    %84 = arith.divf %82, %83 : vector<8x32xf32>
    %85 = vector.extract_strided_slice %75 {offsets = [0, 32], sizes = [8, 32], strides = [1, 1]} : vector<8x96xf32> to vector<8x32xf32>
    %86 = vector.extract_strided_slice %76 {offsets = [0, 32], sizes = [8, 32], strides = [1, 1]} : vector<8x96xf32> to vector<8x32xf32>
    %87 = arith.addf %85, %86 : vector<8x32xf32>
    %88 = arith.negf %87 : vector<8x32xf32>
    %89 = math.exp %88 : vector<8x32xf32>
    %cst_28 = arith.constant 1.000000e+00 : f32
    %90 = vector.broadcast %cst_28 : f32 to vector<8x32xf32>
    %91 = arith.addf %90, %89 : vector<8x32xf32>
    %92 = arith.divf %90, %91 : vector<8x32xf32>
    %93 = vector.extract_strided_slice %75 {offsets = [0, 64], sizes = [8, 32], strides = [1, 1]} : vector<8x96xf32> to vector<8x32xf32>
    %94 = vector.extract_strided_slice %76 {offsets = [0, 64], sizes = [8, 32], strides = [1, 1]} : vector<8x96xf32> to vector<8x32xf32>
    %95 = arith.addf %94, %6 : vector<8x32xf32>
    %96 = arith.mulf %84, %95 : vector<8x32xf32>
    %97 = arith.addf %93, %96 : vector<8x32xf32>
    %98 = math.tanh %97 : vector<8x32xf32>
    %cst_29 = arith.constant 1.000000e+00 : f32
    %99 = vector.broadcast %cst_29 : f32 to vector<8x32xf32>
    %100 = arith.subf %99, %92 : vector<8x32xf32>
    %101 = arith.mulf %100, %98 : vector<8x32xf32>
    %102 = arith.mulf %92, %70 : vector<8x32xf32>
    %103 = arith.addf %101, %102 : vector<8x32xf32>
    %c2_30 = arith.constant 2 : index
    %c0_31 = arith.constant 0 : index
    %c0_32 = arith.constant 0 : index
    %104 = vector.load %arg4[%c2_30, %c0_31, %c0_32] : memref<8x8x32xf32, #tpu.memory_space<vmem>>, vector<1x8x32xf32>
    %105 = vector.shape_cast %104 : vector<1x8x32xf32> to vector<8x32xf32>
    %106 = vector.shape_cast %103 : vector<8x32xf32> to vector<1x8x32xf32>
    tpu.vector_store %arg4[%c2_30, %c0_31, %c0_32], %106 {strides = array<i32>} : memref<8x8x32xf32, #tpu.memory_space<vmem>>, vector<1x8x32xf32>,
    %c3 = arith.constant 3 : index
    %c0_33 = arith.constant 0 : index
    %c0_34 = arith.constant 0 : index
    %107 = vector.load %arg1[%c3, %c0_33, %c0_34] : memref<8x8x96xf32, #tpu.memory_space<vmem>>, vector<1x8x96xf32>
    %108 = vector.shape_cast %107 : vector<1x8x96xf32> to vector<8x96xf32>
    %cst_35 = arith.constant dense<0.000000e+00> : vector<8x96xf32>
    %109 = tpu.matmul %103, %3, %cst_35 {dimension_numbers = #tpu.dot_dimension_numbers<[1], [0], [0], [1], [0, 0, 1, 1], [], []>} : vector<8x32xf32>, vector<32x96xf32>, vector<8x96xf32> -> vector<8x96xf32>
    %110 = vector.extract_strided_slice %108 {offsets = [0, 0], sizes = [8, 32], strides = [1, 1]} : vector<8x96xf32> to vector<8x32xf32>
    %111 = vector.extract_strided_slice %109 {offsets = [0, 0], sizes = [8, 32], strides = [1, 1]} : vector<8x96xf32> to vector<8x32xf32>
    %112 = arith.addf %110, %111 : vector<8x32xf32>
    %113 = arith.negf %112 : vector<8x32xf32>
    %114 = math.exp %113 : vector<8x32xf32>
    %cst_36 = arith.constant 1.000000e+00 : f32
    %115 = vector.broadcast %cst_36 : f32 to vector<8x32xf32>
    %116 = arith.addf %115, %114 : vector<8x32xf32>
    %117 = arith.divf %115, %116 : vector<8x32xf32>
    %118 = vector.extract_strided_slice %108 {offsets = [0, 32], sizes = [8, 32], strides = [1, 1]} : vector<8x96xf32> to vector<8x32xf32>
    %119 = vector.extract_strided_slice %109 {offsets = [0, 32], sizes = [8, 32], strides = [1, 1]} : vector<8x96xf32> to vector<8x32xf32>
    %120 = arith.addf %118, %119 : vector<8x32xf32>
    %121 = arith.negf %120 : vector<8x32xf32>
    %122 = math.exp %121 : vector<8x32xf32>
    %cst_37 = arith.constant 1.000000e+00 : f32
    %123 = vector.broadcast %cst_37 : f32 to vector<8x32xf32>
    %124 = arith.addf %123, %122 : vector<8x32xf32>
    %125 = arith.divf %123, %124 : vector<8x32xf32>
    %126 = vector.extract_strided_slice %108 {offsets = [0, 64], sizes = [8, 32], strides = [1, 1]} : vector<8x96xf32> to vector<8x32xf32>
    %127 = vector.extract_strided_slice %109 {offsets = [0, 64], sizes = [8, 32], strides = [1, 1]} : vector<8x96xf32> to vector<8x32xf32>
    %128 = arith.addf %127, %6 : vector<8x32xf32>
    %129 = arith.mulf %117, %128 : vector<8x32xf32>
    %130 = arith.addf %126, %129 : vector<8x32xf32>
    %131 = math.tanh %130 : vector<8x32xf32>
    %cst_38 = arith.constant 1.000000e+00 : f32
    %132 = vector.broadcast %cst_38 : f32 to vector<8x32xf32>
    %133 = arith.subf %132, %125 : vector<8x32xf32>
    %134 = arith.mulf %133, %131 : vector<8x32xf32>
    %135 = arith.mulf %125, %103 : vector<8x32xf32>
    %136 = arith.addf %134, %135 : vector<8x32xf32>
    %c3_39 = arith.constant 3 : index
    %c0_40 = arith.constant 0 : index
    %c0_41 = arith.constant 0 : index
    %137 = vector.load %arg4[%c3_39, %c0_40, %c0_41] : memref<8x8x32xf32, #tpu.memory_space<vmem>>, vector<1x8x32xf32>
    %138 = vector.shape_cast %137 : vector<1x8x32xf32> to vector<8x32xf32>
    %139 = vector.shape_cast %136 : vector<8x32xf32> to vector<1x8x32xf32>
    tpu.vector_store %arg4[%c3_39, %c0_40, %c0_41], %139 {strides = array<i32>} : memref<8x8x32xf32, #tpu.memory_space<vmem>>, vector<1x8x32xf32>,
    %c4 = arith.constant 4 : index
    %c0_42 = arith.constant 0 : index
    %c0_43 = arith.constant 0 : index
    %140 = vector.load %arg1[%c4, %c0_42, %c0_43] : memref<8x8x96xf32, #tpu.memory_space<vmem>>, vector<1x8x96xf32>
    %141 = vector.shape_cast %140 : vector<1x8x96xf32> to vector<8x96xf32>
    %cst_44 = arith.constant dense<0.000000e+00> : vector<8x96xf32>
    %142 = tpu.matmul %136, %3, %cst_44 {dimension_numbers = #tpu.dot_dimension_numbers<[1], [0], [0], [1], [0, 0, 1, 1], [], []>} : vector<8x32xf32>, vector<32x96xf32>, vector<8x96xf32> -> vector<8x96xf32>
    %143 = vector.extract_strided_slice %141 {offsets = [0, 0], sizes = [8, 32], strides = [1, 1]} : vector<8x96xf32> to vector<8x32xf32>
    %144 = vector.extract_strided_slice %142 {offsets = [0, 0], sizes = [8, 32], strides = [1, 1]} : vector<8x96xf32> to vector<8x32xf32>
    %145 = arith.addf %143, %144 : vector<8x32xf32>
    %146 = arith.negf %145 : vector<8x32xf32>
    %147 = math.exp %146 : vector<8x32xf32>
    %cst_45 = arith.constant 1.000000e+00 : f32
    %148 = vector.broadcast %cst_45 : f32 to vector<8x32xf32>
    %149 = arith.addf %148, %147 : vector<8x32xf32>
    %150 = arith.divf %148, %149 : vector<8x32xf32>
    %151 = vector.extract_strided_slice %141 {offsets = [0, 32], sizes = [8, 32], strides = [1, 1]} : vector<8x96xf32> to vector<8x32xf32>
    %152 = vector.extract_strided_slice %142 {offsets = [0, 32], sizes = [8, 32], strides = [1, 1]} : vector<8x96xf32> to vector<8x32xf32>
    %153 = arith.addf %151, %152 : vector<8x32xf32>
    %154 = arith.negf %153 : vector<8x32xf32>
    %155 = math.exp %154 : vector<8x32xf32>
    %cst_46 = arith.constant 1.000000e+00 : f32
    %156 = vector.broadcast %cst_46 : f32 to vector<8x32xf32>
    %157 = arith.addf %156, %155 : vector<8x32xf32>
    %158 = arith.divf %156, %157 : vector<8x32xf32>
    %159 = vector.extract_strided_slice %141 {offsets = [0, 64], sizes = [8, 32], strides = [1, 1]} : vector<8x96xf32> to vector<8x32xf32>
    %160 = vector.extract_strided_slice %142 {offsets = [0, 64], sizes = [8, 32], strides = [1, 1]} : vector<8x96xf32> to vector<8x32xf32>
    %161 = arith.addf %160, %6 : vector<8x32xf32>
    %162 = arith.mulf %150, %161 : vector<8x32xf32>
    %163 = arith.addf %159, %162 : vector<8x32xf32>
    %164 = math.tanh %163 : vector<8x32xf32>
    %cst_47 = arith.constant 1.000000e+00 : f32
    %165 = vector.broadcast %cst_47 : f32 to vector<8x32xf32>
    %166 = arith.subf %165, %158 : vector<8x32xf32>
    %167 = arith.mulf %166, %164 : vector<8x32xf32>
    %168 = arith.mulf %158, %136 : vector<8x32xf32>
    %169 = arith.addf %167, %168 : vector<8x32xf32>
    %c4_48 = arith.constant 4 : index
    %c0_49 = arith.constant 0 : index
    %c0_50 = arith.constant 0 : index
    %170 = vector.load %arg4[%c4_48, %c0_49, %c0_50] : memref<8x8x32xf32, #tpu.memory_space<vmem>>, vector<1x8x32xf32>
    %171 = vector.shape_cast %170 : vector<1x8x32xf32> to vector<8x32xf32>
    %172 = vector.shape_cast %169 : vector<8x32xf32> to vector<1x8x32xf32>
    tpu.vector_store %arg4[%c4_48, %c0_49, %c0_50], %172 {strides = array<i32>} : memref<8x8x32xf32, #tpu.memory_space<vmem>>, vector<1x8x32xf32>,
    %c5 = arith.constant 5 : index
    %c0_51 = arith.constant 0 : index
    %c0_52 = arith.constant 0 : index
    %173 = vector.load %arg1[%c5, %c0_51, %c0_52] : memref<8x8x96xf32, #tpu.memory_space<vmem>>, vector<1x8x96xf32>
    %174 = vector.shape_cast %173 : vector<1x8x96xf32> to vector<8x96xf32>
    %cst_53 = arith.constant dense<0.000000e+00> : vector<8x96xf32>
    %175 = tpu.matmul %169, %3, %cst_53 {dimension_numbers = #tpu.dot_dimension_numbers<[1], [0], [0], [1], [0, 0, 1, 1], [], []>} : vector<8x32xf32>, vector<32x96xf32>, vector<8x96xf32> -> vector<8x96xf32>
    %176 = vector.extract_strided_slice %174 {offsets = [0, 0], sizes = [8, 32], strides = [1, 1]} : vector<8x96xf32> to vector<8x32xf32>
    %177 = vector.extract_strided_slice %175 {offsets = [0, 0], sizes = [8, 32], strides = [1, 1]} : vector<8x96xf32> to vector<8x32xf32>
    %178 = arith.addf %176, %177 : vector<8x32xf32>
    %179 = arith.negf %178 : vector<8x32xf32>
    %180 = math.exp %179 : vector<8x32xf32>
    %cst_54 = arith.constant 1.000000e+00 : f32
    %181 = vector.broadcast %cst_54 : f32 to vector<8x32xf32>
    %182 = arith.addf %181, %180 : vector<8x32xf32>
    %183 = arith.divf %181, %182 : vector<8x32xf32>
    %184 = vector.extract_strided_slice %174 {offsets = [0, 32], sizes = [8, 32], strides = [1, 1]} : vector<8x96xf32> to vector<8x32xf32>
    %185 = vector.extract_strided_slice %175 {offsets = [0, 32], sizes = [8, 32], strides = [1, 1]} : vector<8x96xf32> to vector<8x32xf32>
    %186 = arith.addf %184, %185 : vector<8x32xf32>
    %187 = arith.negf %186 : vector<8x32xf32>
    %188 = math.exp %187 : vector<8x32xf32>
    %cst_55 = arith.constant 1.000000e+00 : f32
    %189 = vector.broadcast %cst_55 : f32 to vector<8x32xf32>
    %190 = arith.addf %189, %188 : vector<8x32xf32>
    %191 = arith.divf %189, %190 : vector<8x32xf32>
    %192 = vector.extract_strided_slice %174 {offsets = [0, 64], sizes = [8, 32], strides = [1, 1]} : vector<8x96xf32> to vector<8x32xf32>
    %193 = vector.extract_strided_slice %175 {offsets = [0, 64], sizes = [8, 32], strides = [1, 1]} : vector<8x96xf32> to vector<8x32xf32>
    %194 = arith.addf %193, %6 : vector<8x32xf32>
    %195 = arith.mulf %183, %194 : vector<8x32xf32>
    %196 = arith.addf %192, %195 : vector<8x32xf32>
    %197 = math.tanh %196 : vector<8x32xf32>
    %cst_56 = arith.constant 1.000000e+00 : f32
    %198 = vector.broadcast %cst_56 : f32 to vector<8x32xf32>
    %199 = arith.subf %198, %191 : vector<8x32xf32>
    %200 = arith.mulf %199, %197 : vector<8x32xf32>
    %201 = arith.mulf %191, %169 : vector<8x32xf32>
    %202 = arith.addf %200, %201 : vector<8x32xf32>
    %c5_57 = arith.constant 5 : index
    %c0_58 = arith.constant 0 : index
    %c0_59 = arith.constant 0 : index
    %203 = vector.load %arg4[%c5_57, %c0_58, %c0_59] : memref<8x8x32xf32, #tpu.memory_space<vmem>>, vector<1x8x32xf32>
    %204 = vector.shape_cast %203 : vector<1x8x32xf32> to vector<8x32xf32>
    %205 = vector.shape_cast %202 : vector<8x32xf32> to vector<1x8x32xf32>
    tpu.vector_store %arg4[%c5_57, %c0_58, %c0_59], %205 {strides = array<i32>} : memref<8x8x32xf32, #tpu.memory_space<vmem>>, vector<1x8x32xf32>,
    %c6 = arith.constant 6 : index
    %c0_60 = arith.constant 0 : index
    %c0_61 = arith.constant 0 : index
    %206 = vector.load %arg1[%c6, %c0_60, %c0_61] : memref<8x8x96xf32, #tpu.memory_space<vmem>>, vector<1x8x96xf32>
    %207 = vector.shape_cast %206 : vector<1x8x96xf32> to vector<8x96xf32>
    %cst_62 = arith.constant dense<0.000000e+00> : vector<8x96xf32>
    %208 = tpu.matmul %202, %3, %cst_62 {dimension_numbers = #tpu.dot_dimension_numbers<[1], [0], [0], [1], [0, 0, 1, 1], [], []>} : vector<8x32xf32>, vector<32x96xf32>, vector<8x96xf32> -> vector<8x96xf32>
    %209 = vector.extract_strided_slice %207 {offsets = [0, 0], sizes = [8, 32], strides = [1, 1]} : vector<8x96xf32> to vector<8x32xf32>
    %210 = vector.extract_strided_slice %208 {offsets = [0, 0], sizes = [8, 32], strides = [1, 1]} : vector<8x96xf32> to vector<8x32xf32>
    %211 = arith.addf %209, %210 : vector<8x32xf32>
    %212 = arith.negf %211 : vector<8x32xf32>
    %213 = math.exp %212 : vector<8x32xf32>
    %cst_63 = arith.constant 1.000000e+00 : f32
    %214 = vector.broadcast %cst_63 : f32 to vector<8x32xf32>
    %215 = arith.addf %214, %213 : vector<8x32xf32>
    %216 = arith.divf %214, %215 : vector<8x32xf32>
    %217 = vector.extract_strided_slice %207 {offsets = [0, 32], sizes = [8, 32], strides = [1, 1]} : vector<8x96xf32> to vector<8x32xf32>
    %218 = vector.extract_strided_slice %208 {offsets = [0, 32], sizes = [8, 32], strides = [1, 1]} : vector<8x96xf32> to vector<8x32xf32>
    %219 = arith.addf %217, %218 : vector<8x32xf32>
    %220 = arith.negf %219 : vector<8x32xf32>
    %221 = math.exp %220 : vector<8x32xf32>
    %cst_64 = arith.constant 1.000000e+00 : f32
    %222 = vector.broadcast %cst_64 : f32 to vector<8x32xf32>
    %223 = arith.addf %222, %221 : vector<8x32xf32>
    %224 = arith.divf %222, %223 : vector<8x32xf32>
    %225 = vector.extract_strided_slice %207 {offsets = [0, 64], sizes = [8, 32], strides = [1, 1]} : vector<8x96xf32> to vector<8x32xf32>
    %226 = vector.extract_strided_slice %208 {offsets = [0, 64], sizes = [8, 32], strides = [1, 1]} : vector<8x96xf32> to vector<8x32xf32>
    %227 = arith.addf %226, %6 : vector<8x32xf32>
    %228 = arith.mulf %216, %227 : vector<8x32xf32>
    %229 = arith.addf %225, %228 : vector<8x32xf32>
    %230 = math.tanh %229 : vector<8x32xf32>
    %cst_65 = arith.constant 1.000000e+00 : f32
    %231 = vector.broadcast %cst_65 : f32 to vector<8x32xf32>
    %232 = arith.subf %231, %224 : vector<8x32xf32>
    %233 = arith.mulf %232, %230 : vector<8x32xf32>
    %234 = arith.mulf %224, %202 : vector<8x32xf32>
    %235 = arith.addf %233, %234 : vector<8x32xf32>
    %c6_66 = arith.constant 6 : index
    %c0_67 = arith.constant 0 : index
    %c0_68 = arith.constant 0 : index
    %236 = vector.load %arg4[%c6_66, %c0_67, %c0_68] : memref<8x8x32xf32, #tpu.memory_space<vmem>>, vector<1x8x32xf32>
    %237 = vector.shape_cast %236 : vector<1x8x32xf32> to vector<8x32xf32>
    %238 = vector.shape_cast %235 : vector<8x32xf32> to vector<1x8x32xf32>
    tpu.vector_store %arg4[%c6_66, %c0_67, %c0_68], %238 {strides = array<i32>} : memref<8x8x32xf32, #tpu.memory_space<vmem>>, vector<1x8x32xf32>,
    %c7 = arith.constant 7 : index
    %c0_69 = arith.constant 0 : index
    %c0_70 = arith.constant 0 : index
    %239 = vector.load %arg1[%c7, %c0_69, %c0_70] : memref<8x8x96xf32, #tpu.memory_space<vmem>>, vector<1x8x96xf32>
    %240 = vector.shape_cast %239 : vector<1x8x96xf32> to vector<8x96xf32>
    %cst_71 = arith.constant dense<0.000000e+00> : vector<8x96xf32>
    %241 = tpu.matmul %235, %3, %cst_71 {dimension_numbers = #tpu.dot_dimension_numbers<[1], [0], [0], [1], [0, 0, 1, 1], [], []>} : vector<8x32xf32>, vector<32x96xf32>, vector<8x96xf32> -> vector<8x96xf32>
    %242 = vector.extract_strided_slice %240 {offsets = [0, 0], sizes = [8, 32], strides = [1, 1]} : vector<8x96xf32> to vector<8x32xf32>
    %243 = vector.extract_strided_slice %241 {offsets = [0, 0], sizes = [8, 32], strides = [1, 1]} : vector<8x96xf32> to vector<8x32xf32>
    %244 = arith.addf %242, %243 : vector<8x32xf32>
    %245 = arith.negf %244 : vector<8x32xf32>
    %246 = math.exp %245 : vector<8x32xf32>
    %cst_72 = arith.constant 1.000000e+00 : f32
    %247 = vector.broadcast %cst_72 : f32 to vector<8x32xf32>
    %248 = arith.addf %247, %246 : vector<8x32xf32>
    %249 = arith.divf %247, %248 : vector<8x32xf32>
    %250 = vector.extract_strided_slice %240 {offsets = [0, 32], sizes = [8, 32], strides = [1, 1]} : vector<8x96xf32> to vector<8x32xf32>
    %251 = vector.extract_strided_slice %241 {offsets = [0, 32], sizes = [8, 32], strides = [1, 1]} : vector<8x96xf32> to vector<8x32xf32>
    %252 = arith.addf %250, %251 : vector<8x32xf32>
    %253 = arith.negf %252 : vector<8x32xf32>
    %254 = math.exp %253 : vector<8x32xf32>
    %cst_73 = arith.constant 1.000000e+00 : f32
    %255 = vector.broadcast %cst_73 : f32 to vector<8x32xf32>
    %256 = arith.addf %255, %254 : vector<8x32xf32>
    %257 = arith.divf %255, %256 : vector<8x32xf32>
    %258 = vector.extract_strided_slice %240 {offsets = [0, 64], sizes = [8, 32], strides = [1, 1]} : vector<8x96xf32> to vector<8x32xf32>
    %259 = vector.extract_strided_slice %241 {offsets = [0, 64], sizes = [8, 32], strides = [1, 1]} : vector<8x96xf32> to vector<8x32xf32>
    %260 = arith.addf %259, %6 : vector<8x32xf32>
    %261 = arith.mulf %249, %260 : vector<8x32xf32>
    %262 = arith.addf %258, %261 : vector<8x32xf32>
    %263 = math.tanh %262 : vector<8x32xf32>
    %cst_74 = arith.constant 1.000000e+00 : f32
    %264 = vector.broadcast %cst_74 : f32 to vector<8x32xf32>
    %265 = arith.subf %264, %257 : vector<8x32xf32>
    %266 = arith.mulf %265, %263 : vector<8x32xf32>
    %267 = arith.mulf %257, %235 : vector<8x32xf32>
    %268 = arith.addf %266, %267 : vector<8x32xf32>
    %c7_75 = arith.constant 7 : index
    %c0_76 = arith.constant 0 : index
    %c0_77 = arith.constant 0 : index
    %269 = vector.load %arg4[%c7_75, %c0_76, %c0_77] : memref<8x8x32xf32, #tpu.memory_space<vmem>>, vector<1x8x32xf32>
    %270 = vector.shape_cast %269 : vector<1x8x32xf32> to vector<8x32xf32>
    %271 = vector.shape_cast %268 : vector<8x32xf32> to vector<1x8x32xf32>
    tpu.vector_store %arg4[%c7_75, %c0_76, %c0_77], %271 {strides = array<i32>} : memref<8x8x32xf32, #tpu.memory_space<vmem>>, vector<1x8x32xf32>,
    %c0_78 = arith.constant 0 : index
    %c0_79 = arith.constant 0 : index
    %272 = vector.load %arg5[%c0_78, %c0_79] : memref<8x32xf32, #tpu.memory_space<vmem>>, vector<8x32xf32>
    tpu.vector_store %arg5[%c0_78, %c0_79], %268 {strides = array<i32>} : memref<8x32xf32, #tpu.memory_space<vmem>>, vector<8x32xf32>,
    return
  }
  func.func @transform_0(%arg0: i32) -> (i32, i32, i32) {
    %c0_i32 = arith.constant 0 : i32
    %c0_i32_0 = arith.constant 0 : i32
    %c0_i32_1 = arith.constant 0 : i32
    return %arg0, %c0_i32, %c0_i32_0 : i32, i32, i32
  }
  func.func @transform_1(%arg0: i32) -> (i32, i32) {
    %c0_i32 = arith.constant 0 : i32
    %c0_i32_0 = arith.constant 0 : i32
    %c0_i32_1 = arith.constant 0 : i32
    return %c0_i32, %c0_i32_0 : i32, i32
  }
  func.func @transform_2(%arg0: i32) -> (i32, i32) {
    %c0_i32 = arith.constant 0 : i32
    %c0_i32_0 = arith.constant 0 : i32
    %c0_i32_1 = arith.constant 0 : i32
    return %c0_i32, %c0_i32_0 : i32, i32
  }
  func.func @transform_3(%arg0: i32) -> (i32, i32, i32) {
    %c0_i32 = arith.constant 0 : i32
    %c0_i32_0 = arith.constant 0 : i32
    %c0_i32_1 = arith.constant 0 : i32
    return %arg0, %c0_i32, %c0_i32_0 : i32, i32, i32
  }
}

</mosaic_0001>

<bundles_post_ra>
// kernel: squeeze.13
= control target key start
LH: loop header
LB: loop body
LE: loop exit
PB: predicated region body
PF: predicated region fallthrough
CT: control target
= control target key end

     0   :  { %vm3_vm0 = vcmask 130048   ;;  %s793_s12 = smov 112   ;;  %s1069_s0 = inlined_call_operand.vmem [shape: f32[1,8,8,48], index: 0, kind: input, shape index: {}]   ;;  %s1070_s1 = inlined_call_operand.vmem [shape: f32[8,8,3,1,16], index: 1, kind: output, shape index: {}]  }
   0x1   :  { %v715_v0 = vld [vmem:[%s1069_s0 + $0x10] sm:$0xff]   ;;  %v55_v1 = vld [vmem:[%s1069_s0] sm:$0xff]   ;;  %v716_v2 = vld [vmem:[%s1069_s0 + $0x18] sm:$0xff]  }
   0x2   :  { %74 = vrot.lane.b32.xlu1 %v715_v0, %s793_s12  ;;  %56 = vrot.lane.b32.xlu0 %v55_v1, %s793_s12  ;;  %v714_v3 = vld [vmem:[%s1069_s0 + $0x8] sm:$0xff]   ;;  %17 = vst.msk [vmem:[#allocation0 + $0x80] ss:$8 sm:$0xf] %vm3_vm0, %v715_v0   ;;  %v717_v5 = vld [vmem:[%s1069_s0 + $0x20] sm:$0xff]  }
   0x3   :  { %v718_v4 = vld [vmem:[%s1069_s0 + $0x28] sm:$0xff]   ;;  %19 = vst.msk [vmem:[#allocation0 + $0x80] ss:$8 sm:$0xf0] %vm3_vm0, %v715_v0   ;;  %v720_v6 = vld [vmem:[%s1069_s0 + $0x38] sm:$0xff]   ;;  %v719_v7 = vld [vmem:[%s1069_s0 + $0x30] sm:$0xff]  }
   0x4   :  { %4 = vst.msk [vmem:[#allocation0] ss:$8 sm:$0xf] %vm3_vm0, %v55_v1   ;;  %5 = vst.msk [vmem:[#allocation0] ss:$8 sm:$0xf0] %vm3_vm0, %v55_v1  }
   0x5   :  { %24 = vst.msk [vmem:[#allocation0 + $0xc0] ss:$8 sm:$0xf] %vm3_vm0, %v716_v2   ;;  %26 = vst.msk [vmem:[#allocation0 + $0xc0] ss:$8 sm:$0xf0] %vm3_vm0, %v716_v2  }
   0x6   :  { %10 = vst.msk [vmem:[#allocation0 + $0x40] ss:$8 sm:$0xf] %vm3_vm0, %v714_v3   ;;  %12 = vst.msk [vmem:[#allocation0 + $0x40] ss:$8 sm:$0xf0] %vm3_vm0, %v714_v3   ;;  %83 = vrot.lane.b32.xlu1 %v716_v2, %s793_s12  ;;  %65 = vrot.lane.b32.xlu0 %v714_v3, %s793_s12 }
   0x7   :  { %38 = vst.msk [vmem:[#allocation0 + $0x140] ss:$8 sm:$0xf] %vm3_vm0, %v718_v4   ;;  %40 = vst.msk [vmem:[#allocation0 + $0x140] ss:$8 sm:$0xf0] %vm3_vm0, %v718_v4  }
   0x8   :  { %31 = vst.msk [vmem:[#allocation0 + $0x100] ss:$8 sm:$0xf] %vm3_vm0, %v717_v5   ;;  %33 = vst.msk [vmem:[#allocation0 + $0x100] ss:$8 sm:$0xf0] %vm3_vm0, %v717_v5  }
   0x9   :  { %52 = vst.msk [vmem:[#allocation0 + $0x1c0] ss:$8 sm:$0xf] %vm3_vm0, %v720_v6   ;;  %54 = vst.msk [vmem:[#allocation0 + $0x1c0] ss:$8 sm:$0xf0] %vm3_vm0, %v720_v6  }
   0xa   :  { %45 = vst.msk [vmem:[#allocation0 + $0x180] ss:$8 sm:$0xf] %vm3_vm0, %v719_v7   ;;  %47 = vst.msk [vmem:[#allocation0 + $0x180] ss:$8 sm:$0xf0] %vm3_vm0, %v719_v7   ;;  %101 = vrot.lane.b32.xlu1 %v718_v4, %s793_s12  ;;  %92 = vrot.lane.b32.xlu0 %v717_v5, %s793_s12 }
   0xb   :  { %s794_s0 = smov 96  }
   0xe   :  { %119 = vrot.lane.b32.xlu1 %v720_v6, %s793_s12  ;;  %110 = vrot.lane.b32.xlu0 %v719_v7, %s793_s12 }
  0x12   :  { %136 = vrot.lane.b32.xlu1 %v714_v3, %s794_s0  ;;  %127 = vrot.lane.b32.xlu0 %v55_v1, %s794_s0 }
  0x16   :  { %154 = vrot.lane.b32.xlu1 %v716_v2, %s794_s0  ;;  %145 = vrot.lane.b32.xlu0 %v715_v0, %s794_s0 }
  0x1a   :  { %172 = vrot.lane.b32.xlu1 %v718_v4, %s794_s0  ;;  %163 = vrot.lane.b32.xlu0 %v717_v5, %s794_s0 }
  0x1e   :  { %190 = vrot.lane.b32.xlu1 %v720_v6, %s794_s0  ;;  %181 = vrot.lane.b32.xlu0 %v719_v7, %s794_s0 }
  0x74   :  { %v75_v8 = vpop.permute.xlu1 %74   ;;  %v57_v9 = vpop.permute.xlu0 %56  }
  0x75   :  { %78 = vst.msk [vmem:[#allocation0 + $0x81] ss:$8 sm:$0xf] %vm3_vm0, %v75_v8   ;;  %80 = vst.msk [vmem:[#allocation0 + $0x81] ss:$8 sm:$0xf0] %vm3_vm0, %v75_v8  }
  0x76   :  { %60 = vst.msk [vmem:[#allocation0 + $0x1] ss:$8 sm:$0xf] %vm3_vm0, %v57_v9   ;;  %62 = vst.msk [vmem:[#allocation0 + $0x1] ss:$8 sm:$0xf0] %vm3_vm0, %v57_v9  }
  0x78   :  { %v84_v10 = vpop.permute.xlu1 %83   ;;  %v66_v11 = vpop.permute.xlu0 %65  }
  0x79   :  { %87 = vst.msk [vmem:[#allocation0 + $0xc1] ss:$8 sm:$0xf] %vm3_vm0, %v84_v10   ;;  %89 = vst.msk [vmem:[#allocation0 + $0xc1] ss:$8 sm:$0xf0] %vm3_vm0, %v84_v10  }
  0x7a   :  { %69 = vst.msk [vmem:[#allocation0 + $0x41] ss:$8 sm:$0xf] %vm3_vm0, %v66_v11   ;;  %71 = vst.msk [vmem:[#allocation0 + $0x41] ss:$8 sm:$0xf0] %vm3_vm0, %v66_v11  }
  0x7c   :  { %v102_v12 = vpop.permute.xlu1 %101   ;;  %v93_v13 = vpop.permute.xlu0 %92  }
  0x7d   :  { %105 = vst.msk [vmem:[#allocation0 + $0x141] ss:$8 sm:$0xf] %vm3_vm0, %v102_v12   ;;  %107 = vst.msk [vmem:[#allocation0 + $0x141] ss:$8 sm:$0xf0] %vm3_vm0, %v102_v12  }
  0x7e   :  { %96 = vst.msk [vmem:[#allocation0 + $0x101] ss:$8 sm:$0xf] %vm3_vm0, %v93_v13   ;;  %98 = vst.msk [vmem:[#allocation0 + $0x101] ss:$8 sm:$0xf0] %vm3_vm0, %v93_v13  }
  0x80   :  { %v120_v14 = vpop.permute.xlu1 %119   ;;  %v111_v15 = vpop.permute.xlu0 %110  }
  0x81   :  { %123 = vst.msk [vmem:[#allocation0 + $0x1c1] ss:$8 sm:$0xf] %vm3_vm0, %v120_v14   ;;  %125 = vst.msk [vmem:[#allocation0 + $0x1c1] ss:$8 sm:$0xf0] %vm3_vm0, %v120_v14  }
  0x82   :  { %114 = vst.msk [vmem:[#allocation0 + $0x181] ss:$8 sm:$0xf] %vm3_vm0, %v111_v15   ;;  %116 = vst.msk [vmem:[#allocation0 + $0x181] ss:$8 sm:$0xf0] %vm3_vm0, %v111_v15  }
  0x84   :  { %v137_v16 = vpop.permute.xlu1 %136   ;;  %v128_v17 = vpop.permute.xlu0 %127  }
  0x85   :  { %140 = vst.msk [vmem:[#allocation0 + $0x42] ss:$8 sm:$0xf] %vm3_vm0, %v137_v16   ;;  %142 = vst.msk [vmem:[#allocation0 + $0x42] ss:$8 sm:$0xf0] %vm3_vm0, %v137_v16  }
  0x86   :  { %131 = vst.msk [vmem:[#allocation0 + $0x2] ss:$8 sm:$0xf] %vm3_vm0, %v128_v17   ;;  %133 = vst.msk [vmem:[#allocation0 + $0x2] ss:$8 sm:$0xf0] %vm3_vm0, %v128_v17  }
  0x88   :  { %v155_v18 = vpop.permute.xlu1 %154   ;;  %v146_v19 = vpop.permute.xlu0 %145  }
  0x89   :  { %158 = vst.msk [vmem:[#allocation0 + $0xc2] ss:$8 sm:$0xf] %vm3_vm0, %v155_v18   ;;  %160 = vst.msk [vmem:[#allocation0 + $0xc2] ss:$8 sm:$0xf0] %vm3_vm0, %v155_v18  }
  0x8a   :  { %149 = vst.msk [vmem:[#allocation0 + $0x82] ss:$8 sm:$0xf] %vm3_vm0, %v146_v19   ;;  %151 = vst.msk [vmem:[#allocation0 + $0x82] ss:$8 sm:$0xf0] %vm3_vm0, %v146_v19  }
  0x8c   :  { %v254_v20 = vld [vmem:[#allocation0 + $0x40] sm:$0xf]  ;;  %v261_v21 = vld [vmem:[#allocation0 + $0x48] sm:$0xf]  ;;  %v268_v22 = vld [vmem:[#allocation0 + $0x50] sm:$0xf]  ;;  %v173_v23 = vpop.permute.xlu1 %172   ;;  %v164_v24 = vpop.permute.xlu0 %163  }
  0x8d   :  { %v275_v25 = vld [vmem:[#allocation0 + $0x58] sm:$0xf]  ;;  %v282_v26 = vld [vmem:[#allocation0 + $0x60] sm:$0xf]  ;;  %v289_v27 = vld [vmem:[#allocation0 + $0x68] sm:$0xf] }
  0x8e   :  { %735 = vst [vmem:[%s1070_s1 + $0x20] sm:$0xf] %v254_v20  ;;  %736 = vst [vmem:[%s1070_s1 + $0x24] sm:$0xf] %v261_v21  ;;  %v296_v28 = vld [vmem:[#allocation0 + $0x70] sm:$0xf] }
  0x8f   :  { %737 = vst [vmem:[%s1070_s1 + $0x28] sm:$0xf] %v268_v22  ;;  %176 = vst.msk [vmem:[#allocation0 + $0x142] ss:$8 sm:$0xf] %vm3_vm0, %v173_v23  }
  0x90   :  { %178 = vst.msk [vmem:[#allocation0 + $0x142] ss:$8 sm:$0xf0] %vm3_vm0, %v173_v23   ;;  %167 = vst.msk [vmem:[#allocation0 + $0x102] ss:$8 sm:$0xf] %vm3_vm0, %v164_v24   ;;  %v191_v37 = vpop.permute.xlu1 %190   ;;  %v182_v38 = vpop.permute.xlu0 %181  }
  0x91   :  { %169 = vst.msk [vmem:[#allocation0 + $0x102] ss:$8 sm:$0xf0] %vm3_vm0, %v164_v24   ;;  %v303_v29 = vld [vmem:[#allocation0 + $0x78] sm:$0xf] }
  0x92   :  { %v201_v30 = vld [vmem:[#allocation0] sm:$0xf]  ;;  %738 = vst [vmem:[%s1070_s1 + $0x2c] sm:$0xf] %v275_v25  ;;  %739 = vst [vmem:[%s1070_s1 + $0x30] sm:$0xf] %v282_v26 }
  0x93   :  { %740 = vst [vmem:[%s1070_s1 + $0x34] sm:$0xf] %v289_v27  ;;  %v206_v31 = vld [vmem:[#allocation0 + $0x8] sm:$0xf]  ;;  %v212_v32 = vld [vmem:[#allocation0 + $0x10] sm:$0xf] }
  0x94   :  { %v219_v33 = vld [vmem:[#allocation0 + $0x18] sm:$0xf]  ;;  %741 = vst [vmem:[%s1070_s1 + $0x38] sm:$0xf] %v296_v28  ;;  %742 = vst [vmem:[%s1070_s1 + $0x3c] sm:$0xf] %v303_v29 }
  0x95   :  { %204 = vst [vmem:[%s1070_s1] sm:$0xf] %v201_v30  ;;  %v226_v34 = vld [vmem:[#allocation0 + $0x20] sm:$0xf]  ;;  %v233_v35 = vld [vmem:[#allocation0 + $0x28] sm:$0xf] }
  0x96   :  { %v240_v36 = vld [vmem:[#allocation0 + $0x30] sm:$0xf]  ;;  %728 = vst [vmem:[%s1070_s1 + $0x4] sm:$0xf] %v206_v31  ;;  %729 = vst [vmem:[%s1070_s1 + $0x8] sm:$0xf] %v212_v32 }
  0x97   :  { %730 = vst [vmem:[%s1070_s1 + $0xc] sm:$0xf] %v219_v33  ;;  %v247_v39 = vld [vmem:[#allocation0 + $0x38] sm:$0xf]  ;;  %731 = vst [vmem:[%s1070_s1 + $0x10] sm:$0xf] %v226_v34 }
  0x98   :  { %732 = vst [vmem:[%s1070_s1 + $0x14] sm:$0xf] %v233_v35  ;;  %733 = vst [vmem:[%s1070_s1 + $0x18] sm:$0xf] %v240_v36  ;;  %v366_v40 = vld [vmem:[#allocation0 + $0xc0] sm:$0xf] }
  0x99   :  { %v373_v41 = vld [vmem:[#allocation0 + $0xc8] sm:$0xf]  ;;  %194 = vst.msk [vmem:[#allocation0 + $0x1c2] ss:$8 sm:$0xf] %vm3_vm0, %v191_v37  }
  0x9a   :  { %196 = vst.msk [vmem:[#allocation0 + $0x1c2] ss:$8 sm:$0xf0] %vm3_vm0, %v191_v37   ;;  %185 = vst.msk [vmem:[#allocation0 + $0x182] ss:$8 sm:$0xf] %vm3_vm0, %v182_v38  }
  0x9b   :  { %187 = vst.msk [vmem:[#allocation0 + $0x182] ss:$8 sm:$0xf0] %vm3_vm0, %v182_v38   ;;  %734 = vst [vmem:[%s1070_s1 + $0x1c] sm:$0xf] %v247_v39 }
  0x9c   :  { %v380_v42 = vld [vmem:[#allocation0 + $0xd0] sm:$0xf]  ;;  %v387_v43 = vld [vmem:[#allocation0 + $0xd8] sm:$0xf]  ;;  %v394_v44 = vld [vmem:[#allocation0 + $0xe0] sm:$0xf] }
  0x9d   :  { %751 = vst [vmem:[%s1070_s1 + $0x60] sm:$0xf] %v366_v40  ;;  %752 = vst [vmem:[%s1070_s1 + $0x64] sm:$0xf] %v373_v41  ;;  %v401_v45 = vld [vmem:[#allocation0 + $0xe8] sm:$0xf] }
  0x9e   :  { %v408_v46 = vld [vmem:[#allocation0 + $0xf0] sm:$0xf]  ;;  %v415_v47 = vld [vmem:[#allocation0 + $0xf8] sm:$0xf]  ;;  %753 = vst [vmem:[%s1070_s1 + $0x68] sm:$0xf] %v380_v42 }
  0x9f   :  { %754 = vst [vmem:[%s1070_s1 + $0x6c] sm:$0xf] %v387_v43  ;;  %755 = vst [vmem:[%s1070_s1 + $0x70] sm:$0xf] %v394_v44  ;;  %v310_v48 = vld [vmem:[#allocation0 + $0x80] sm:$0xf] }
  0xa0   :  { %v317_v49 = vld [vmem:[#allocation0 + $0x88] sm:$0xf]  ;;  %v324_v50 = vld [vmem:[#allocation0 + $0x90] sm:$0xf]  ;;  %756 = vst [vmem:[%s1070_s1 + $0x74] sm:$0xf] %v401_v45 }
  0xa1   :  { %757 = vst [vmem:[%s1070_s1 + $0x78] sm:$0xf] %v408_v46  ;;  %758 = vst [vmem:[%s1070_s1 + $0x7c] sm:$0xf] %v415_v47  ;;  %v331_v51 = vld [vmem:[#allocation0 + $0x98] sm:$0xf] }
  0xa2   :  { %v338_v52 = vld [vmem:[#allocation0 + $0xa0] sm:$0xf]  ;;  %v345_v53 = vld [vmem:[#allocation0 + $0xa8] sm:$0xf]  ;;  %743 = vst [vmem:[%s1070_s1 + $0x40] sm:$0xf] %v310_v48 }
  0xa3   :  { %744 = vst [vmem:[%s1070_s1 + $0x44] sm:$0xf] %v317_v49  ;;  %745 = vst [vmem:[%s1070_s1 + $0x48] sm:$0xf] %v324_v50  ;;  %v352_v54 = vld [vmem:[#allocation0 + $0xb0] sm:$0xf] }
  0xa4   :  { %v359_v55 = vld [vmem:[#allocation0 + $0xb8] sm:$0xf]  ;;  %746 = vst [vmem:[%s1070_s1 + $0x4c] sm:$0xf] %v331_v51  ;;  %747 = vst [vmem:[%s1070_s1 + $0x50] sm:$0xf] %v338_v52 }
  0xa5   :  { %748 = vst [vmem:[%s1070_s1 + $0x54] sm:$0xf] %v345_v53  ;;  %v478_v56 = vld [vmem:[#allocation0 + $0x140] sm:$0xf]  ;;  %749 = vst [vmem:[%s1070_s1 + $0x58] sm:$0xf] %v352_v54 }
  0xa6   :  { %750 = vst [vmem:[%s1070_s1 + $0x5c] sm:$0xf] %v359_v55  ;;  %v485_v57 = vld [vmem:[#allocation0 + $0x148] sm:$0xf]  ;;  %v492_v58 = vld [vmem:[#allocation0 + $0x150] sm:$0xf] }
  0xa7   :  { %v499_v59 = vld [vmem:[#allocation0 + $0x158] sm:$0xf]  ;;  %767 = vst [vmem:[%s1070_s1 + $0xa0] sm:$0xf] %v478_v56  ;;  %v506_v60 = vld [vmem:[#allocation0 + $0x160] sm:$0xf] }
  0xa8   :  { %v513_v61 = vld [vmem:[#allocation0 + $0x168] sm:$0xf]  ;;  %v520_v62 = vld [vmem:[#allocation0 + $0x170] sm:$0xf]  ;;  %768 = vst [vmem:[%s1070_s1 + $0xa4] sm:$0xf] %v485_v57 }
  0xa9   :  { %769 = vst [vmem:[%s1070_s1 + $0xa8] sm:$0xf] %v492_v58  ;;  %770 = vst [vmem:[%s1070_s1 + $0xac] sm:$0xf] %v499_v59  ;;  %v527_v63 = vld [vmem:[#allocation0 + $0x178] sm:$0xf] }
  0xaa   :  { %v422_v0 = vld [vmem:[#allocation0 + $0x100] sm:$0xf]  ;;  %v429_v1 = vld [vmem:[#allocation0 + $0x108] sm:$0xf]  ;;  %771 = vst [vmem:[%s1070_s1 + $0xb0] sm:$0xf] %v506_v60 }
  0xab   :  { %772 = vst [vmem:[%s1070_s1 + $0xb4] sm:$0xf] %v513_v61  ;;  %773 = vst [vmem:[%s1070_s1 + $0xb8] sm:$0xf] %v520_v62  ;;  %v436_v2 = vld [vmem:[#allocation0 + $0x110] sm:$0xf] }
  0xac   :  { %v443_v3 = vld [vmem:[#allocation0 + $0x118] sm:$0xf]  ;;  %v450_v4 = vld [vmem:[#allocation0 + $0x120] sm:$0xf]  ;;  %774 = vst [vmem:[%s1070_s1 + $0xbc] sm:$0xf] %v527_v63 }
  0xad   :  { %759 = vst [vmem:[%s1070_s1 + $0x80] sm:$0xf] %v422_v0  ;;  %760 = vst [vmem:[%s1070_s1 + $0x84] sm:$0xf] %v429_v1  ;;  %v457_v5 = vld [vmem:[#allocation0 + $0x128] sm:$0xf] }
  0xae   :  { %v464_v6 = vld [vmem:[#allocation0 + $0x130] sm:$0xf]  ;;  %v471_v7 = vld [vmem:[#allocation0 + $0x138] sm:$0xf]  ;;  %761 = vst [vmem:[%s1070_s1 + $0x88] sm:$0xf] %v436_v2 }
  0xaf   :  { %762 = vst [vmem:[%s1070_s1 + $0x8c] sm:$0xf] %v443_v3  ;;  %763 = vst [vmem:[%s1070_s1 + $0x90] sm:$0xf] %v450_v4  ;;  %v590_v8 = vld [vmem:[#allocation0 + $0x1c0] sm:$0xf] }
  0xb0   :  { %v597_v9 = vld [vmem:[#allocation0 + $0x1c8] sm:$0xf]  ;;  %v604_v10 = vld [vmem:[#allocation0 + $0x1d0] sm:$0xf]  ;;  %764 = vst [vmem:[%s1070_s1 + $0x94] sm:$0xf] %v457_v5 }
  0xb1   :  { %765 = vst [vmem:[%s1070_s1 + $0x98] sm:$0xf] %v464_v6  ;;  %766 = vst [vmem:[%s1070_s1 + $0x9c] sm:$0xf] %v471_v7  ;;  %v611_v11 = vld [vmem:[#allocation0 + $0x1d8] sm:$0xf] }
  0xb2   :  { %783 = vst [vmem:[%s1070_s1 + $0xe0] sm:$0xf] %v590_v8  ;;  %784 = vst [vmem:[%s1070_s1 + $0xe4] sm:$0xf] %v597_v9  ;;  %v618_v12 = vld [vmem:[#allocation0 + $0x1e0] sm:$0xf] }
  0xb3   :  { %785 = vst [vmem:[%s1070_s1 + $0xe8] sm:$0xf] %v604_v10  ;;  %v625_v13 = vld [vmem:[#allocation0 + $0x1e8] sm:$0xf]  ;;  %786 = vst [vmem:[%s1070_s1 + $0xec] sm:$0xf] %v611_v11 }
  0xb4   :  { %787 = vst [vmem:[%s1070_s1 + $0xf0] sm:$0xf] %v618_v12  ;;  %788 = vst [vmem:[%s1070_s1 + $0xf4] sm:$0xf] %v625_v13  ;;  %v632_v14 = vld [vmem:[#allocation0 + $0x1f0] sm:$0xf] }
  0xb5   :  { %v639_v15 = vld [vmem:[#allocation0 + $0x1f8] sm:$0xf]  ;;  %v534_v16 = vld [vmem:[#allocation0 + $0x180] sm:$0xf]  ;;  %789 = vst [vmem:[%s1070_s1 + $0xf8] sm:$0xf] %v632_v14 }
  0xb6   :  { %790 = vst [vmem:[%s1070_s1 + $0xfc] sm:$0xf] %v639_v15  ;;  %775 = vst [vmem:[%s1070_s1 + $0xc0] sm:$0xf] %v534_v16  ;;  %v541_v17 = vld [vmem:[#allocation0 + $0x188] sm:$0xf] }
  0xb7   :  { %v548_v18 = vld [vmem:[#allocation0 + $0x190] sm:$0xf]  ;;  %v555_v19 = vld [vmem:[#allocation0 + $0x198] sm:$0xf]  ;;  %776 = vst [vmem:[%s1070_s1 + $0xc4] sm:$0xf] %v541_v17 }
  0xb8   :  { %777 = vst [vmem:[%s1070_s1 + $0xc8] sm:$0xf] %v548_v18  ;;  %778 = vst [vmem:[%s1070_s1 + $0xcc] sm:$0xf] %v555_v19  ;;  %v562_v20 = vld [vmem:[#allocation0 + $0x1a0] sm:$0xf] }
  0xb9   :  { %v569_v21 = vld [vmem:[#allocation0 + $0x1a8] sm:$0xf]  ;;  %v576_v22 = vld [vmem:[#allocation0 + $0x1b0] sm:$0xf]  ;;  %779 = vst [vmem:[%s1070_s1 + $0xd0] sm:$0xf] %v562_v20 }
  0xba   :  { %780 = vst [vmem:[%s1070_s1 + $0xd4] sm:$0xf] %v569_v21  ;;  %781 = vst [vmem:[%s1070_s1 + $0xd8] sm:$0xf] %v576_v22  ;;  %v583_v23 = vld [vmem:[#allocation0 + $0x1b8] sm:$0xf] }
  0xbb   :  { %782 = vst [vmem:[%s1070_s1 + $0xdc] sm:$0xf] %v583_v23 }

// kernel: rnn_forward.2
= control target key start
LH: loop header
LB: loop body
LE: loop exit
PB: predicated region body
PF: predicated region fallthrough
CT: control target
= control target key end

     0   :  { %vm18_vm0 = vcmask 261120   ;;  %v1110_v0 = vmov 0.0   ;;  %vm1111_vm1 = vmmov 0   ;;  %s1112_s20 = smov 64   ;;  %s1114_s24 = smov 96   ;;  %s1348_s1 = inlined_call_operand.vmem [shape: f32[32,96], index: 1, kind: input, shape index: {}]   ;;  %s1349_s2 = inlined_call_operand.vmem [shape: f32[1,32], index: 2, kind: input, shape index: {}]   ;;  %s1350_s0 = inlined_call_operand.vmem [shape: f32[8,8,96], index: 0, kind: input, shape index: {}]   ;;  %s1351_s3 = inlined_call_operand.vmem [shape: f32[8,8,32], index: 3, kind: output, shape index: {}]  }
   0x1   :  { %969 = vmatprep.subr.mxu0 %v1110_v0  ;;  %v1139_v1 = vld [vmem:[%s1348_s1 + $0x18] sm:$0xff]  ;;  %v1144_v2 = vld [vmem:[%s1348_s1 + $0x10] sm:$0xff]  ;;  %977 = vmatprep.mubr.msk.f32.mxu0 %vm1111_vm1, %v1110_v0  ;;  %19 = vst.msk [vmem:[#allocation2] sm:$0xff] %vm18_vm0, %v1110_v0  ;;  %v898_v3 = vld [vmem:[%s1349_s2] ss:$0 sm:$0xff] }
   0x2   :  { %970 = vmatpush3.msra.mxu0 %v1139_v1  ;;  %980 = vmatprep.subr.mxu1 %v1110_v0  ;;  %v1159_v4 = vld [vmem:[%s1348_s1 + $0x8] sm:$0xff]  ;;  %v1168_v5 = vld [vmem:[%s1348_s1] sm:$0xff]  ;;  %s1113_s1 = smov 32   ;;  %v905_v52 = vld [vmem:[%s1350_s0 + $0x10] sm:$0xff] }
   0x3   :  { %971 = vmatprep.subr.mxu0 %v1110_v0  ;;  %113 = vrot.lane.b32.xlu0 %v898_v3, %s1112_s20  ;;  %v31_v11 = vld [vmem:[%s1350_s0] sm:$0xff]  ;;  %v901_v32 = vld [vmem:[%s1350_s0 + $0x8] sm:$0xff] }
   0x4   :  { %972 = vmatpush3.msra.mxu0 %v1144_v2  ;;  %981 = vmatpush3.msra.mxu1 %v1139_v1 }
   0x5   :  { %973 = vmatprep.subr.mxu0 %v1110_v0  ;;  %982 = vmatprep.subr.mxu1 %v1110_v0 }
   0x6   :  { %974 = vmatpush3.msra.mxu0 %v1159_v4  ;;  %983 = vmatpush3.msra.mxu1 %v1144_v2 }
   0x7   :  { %975 = vmatprep.subr.mxu0 %v1110_v0  ;;  %984 = vmatprep.subr.mxu1 %v1110_v0 }
   0x8   :  { %976 = vmatpush3.msra.mxu0 %v1168_v5  ;;  %v30_v6 = vld [vmem:[#allocation2] sm:$0xff]  ;;  %985 = vmatpush3.msra.mxu1 %v1159_v4 }
   0x9   :  { %978 = vmatmul.mubr.msk.f32.vlgmr.msra.gmra.mxu0 %vm18_vm0, %v30_v6  ;;  %986 = vmatprep.subr.mxu1 %v1110_v0 }
   0xa   :  { %987 = vmatpush3.msra.mxu1 %v1168_v5  ;;  %988 = vmatprep.mubr.msk.f32.mxu1 %vm1111_vm1, %v1110_v0 }
   0xb   :  { %991 = vmatprep.subr.mxu0 %v1110_v0  ;;  %999 = vmatprep.mubr.msk.f32.mxu0 %vm1111_vm1, %v1110_v0 }
   0xc   :  { %992 = vmatpush3.msra.mxu0 %v1139_v1  ;;  %1002 = vmatprep.subr.mxu1 %v1110_v0 }
   0xd   :  { %993 = vmatprep.subr.mxu0 %v1110_v0 }
   0xe   :  { %994 = vmatpush3.msra.mxu0 %v1144_v2 }
   0xf   :  { %995 = vmatprep.subr.mxu0 %v1110_v0 }
  0x10   :  { %996 = vmatpush3.msra.mxu0 %v1159_v4 }
  0x11   :  { %997 = vmatprep.subr.mxu0 %v1110_v0 }
  0x12   :  { %998 = vmatpush3.msra.mxu0 %v1168_v5 }
  0x13   :  { %1013 = vmatprep.subr.mxu0 %v1110_v0 }
  0x75   :  { %v1194_v7 = vpop.permute.xlu0 %113 }
  0xc9   :  { %v102_v8 = vpop.f32.mrf.mxu0 }
  0xca   :  { %v116_v9 = vadd.f32 %v1194_v7, %v102_v8  ;;  %v106_v12 = vadd.f32 %v102_v8, %v31_v11 }
  0xcb   :  { %v979_v10 = vpop.f32.mrf.mxu0 }
  0xcc   :  { %118 = vrot.lane.b32.xlu0 %v116_v9, %s1112_s20  ;;  %v900_v13 = vmul.f32 -1.442695, %v106_v12 }
  0xce   :  { %1062 = vpow2.f32 %v900_v13 }
  0xd0   :  { %134 = vrot.lane.b32.xlu0 %v30_v6, %s1113_s1 }
  0xdb   :  { %v1063_v14 = vpop.eup %1062 }
  0xdc   :  { %v110_v15 = vadd.f32 1.0, %v1063_v14  ;;  %v909_v14 = vld [vmem:[%s1350_s0 + $0x18] sm:$0xff] }
  0xde   :  { %1064 = vrcp.f32 %v110_v15 }
  0xeb   :  { %v1065_v16 = vpop.eup %1064 }
  0xec   :  { %v128_v23 = vsub.f32 1.0, %v1065_v16 }
 0x13e   :  { %v119_v17 = vpop.permute.xlu0 %118 }
 0x13f   :  { %v121_v18 = vmul.f32 %v1065_v16, %v119_v17 }
 0x141   :  { %123 = vrot.lane.b32.xlu1 %v121_v18, %s1112_s20 }
 0x142   :  { %v135_v22 = vpop.permute.xlu0 %134 }
 0x143   :  { %v137_v25 = vmul.f32 %v1065_v16, %v135_v22 }
 0x1b3   :  { %v124_v19 = vpop.permute.xlu1 %123 }
 0x1b4   :  { %v126_v20 = vadd.f32 %v124_v19, %v31_v11 }
 0x1b6   :  { %1066 = vtanh.f32 %v126_v20 }
 0x1c3   :  { %v1067_v21 = vpop.eup %1066 }
 0x1c4   :  { %130 = vrot.lane.b32.xlu1 %v1067_v21, %s1114_s24 }
 0x236   :  { %v131_v24 = vpop.permute.xlu1 %130 }
 0x237   :  { %v133_v26 = vmul.f32 %v131_v24, %v128_v23 }
 0x239   :  { %v138_v27 = vadd.f32 %v137_v25, %v133_v26 }
 0x23b   :  { %140 = vrot.lane.b32.xlu1 %v138_v27, %s1114_s24 }
 0x2ad   :  { %v141_v28 = vpop.permute.xlu1 %140 }
 0x2ae   :  { %143 = vst.msk [vmem:[%s1351_s3] sm:$0xff] %vm18_vm0, %v141_v28  ;;  %989 = vmatmul.mubr.msk.f32.vlgmr.msra.gmra.mxu1 %vm18_vm0, %v141_v28 }
 0x2af   :  { %1003 = vmatpush3.msra.mxu1 %v1139_v1  ;;  %1010 = vmatprep.mubr.msk.f32.mxu1 %vm1111_vm1, %v1110_v0 }
 0x2b0   :  { %1004 = vmatprep.subr.mxu1 %v1110_v0 }
 0x2b1   :  { %1005 = vmatpush3.msra.mxu1 %v1144_v2 }
 0x2b2   :  { %1006 = vmatprep.subr.mxu1 %v1110_v0 }
 0x2b3   :  { %1007 = vmatpush3.msra.mxu1 %v1159_v4 }
 0x2b4   :  { %1008 = vmatprep.subr.mxu1 %v1110_v0 }
 0x2b5   :  { %1009 = vmatpush3.msra.mxu1 %v1168_v5 }
 0x2b6   :  { %1024 = vmatprep.subr.mxu1 %v1110_v0 }
 0x36e   :  { %v214_v29 = vpop.f32.mrf.mxu1 }
 0x36f   :  { %v225_v30 = vadd.f32 %v214_v29, %v1194_v7  ;;  %v218_v33 = vadd.f32 %v901_v32, %v214_v29 }
 0x370   :  { %v990_v31 = vpop.f32.mrf.mxu1 }
 0x371   :  { %227 = vrot.lane.b32.xlu0 %v225_v30, %s1112_s20  ;;  %v903_v34 = vmul.f32 -1.442695, %v218_v33 }
 0x373   :  { %1068 = vpow2.f32 %v903_v34  ;;  %v913_v34 = vld [vmem:[%s1350_s0 + $0x20] sm:$0xff] }
 0x380   :  { %v1069_v35 = vpop.eup %1068 }
 0x381   :  { %v222_v36 = vadd.f32 1.0, %v1069_v35 }
 0x383   :  { %1070 = vrcp.f32 %v222_v36 }
 0x390   :  { %v1071_v37 = vpop.eup %1070 }
 0x391   :  { %v237_v43 = vsub.f32 1.0, %v1071_v37  ;;  %v243_v45 = vmul.f32 %v1071_v37, %v138_v27 }
 0x3e3   :  { %v228_v38 = vpop.permute.xlu0 %227 }
 0x3e4   :  { %v230_v39 = vmul.f32 %v1071_v37, %v228_v38 }
 0x3e6   :  { %232 = vrot.lane.b32.xlu1 %v230_v39, %s1112_s20 }
 0x458   :  { %v233_v40 = vpop.permute.xlu1 %232 }
 0x459   :  { %v235_v41 = vadd.f32 %v901_v32, %v233_v40 }
 0x45b   :  { %1072 = vtanh.f32 %v235_v41 }
 0x468   :  { %v1073_v42 = vpop.eup %1072 }
 0x469   :  { %239 = vrot.lane.b32.xlu0 %v1073_v42, %s1114_s24 }
 0x4db   :  { %v240_v44 = vpop.permute.xlu0 %239 }
 0x4dc   :  { %v242_v46 = vmul.f32 %v240_v44, %v237_v43 }
 0x4de   :  { %v244_v47 = vadd.f32 %v243_v45, %v242_v46 }
 0x4e0   :  { %246 = vrot.lane.b32.xlu1 %v244_v47, %s1114_s24 }
 0x552   :  { %v247_v48 = vpop.permute.xlu1 %246 }
 0x553   :  { %904 = vst.msk [vmem:[%s1351_s3 + $0x8] sm:$0xff] %vm18_vm0, %v247_v48  ;;  %1000 = vmatmul.mubr.msk.f32.vlgmr.msra.gmra.mxu0 %vm18_vm0, %v247_v48 }
 0x554   :  { %1014 = vmatpush3.msra.mxu0 %v1139_v1  ;;  %1021 = vmatprep.mubr.msk.f32.mxu0 %vm1111_vm1, %v1110_v0 }
 0x555   :  { %1015 = vmatprep.subr.mxu0 %v1110_v0 }
 0x556   :  { %1016 = vmatpush3.msra.mxu0 %v1144_v2 }
 0x557   :  { %1017 = vmatprep.subr.mxu0 %v1110_v0 }
 0x558   :  { %1018 = vmatpush3.msra.mxu0 %v1159_v4 }
 0x559   :  { %1019 = vmatprep.subr.mxu0 %v1110_v0 }
 0x55a   :  { %1020 = vmatpush3.msra.mxu0 %v1168_v5 }
 0x55b   :  { %1035 = vmatprep.subr.mxu0 %v1110_v0 }
 0x613   :  { %v321_v49 = vpop.f32.mrf.mxu0 }
 0x614   :  { %v332_v50 = vadd.f32 %v321_v49, %v1194_v7  ;;  %v325_v53 = vadd.f32 %v905_v52, %v321_v49 }
 0x615   :  { %v1001_v51 = vpop.f32.mrf.mxu0 }
 0x616   :  { %334 = vrot.lane.b32.xlu0 %v332_v50, %s1112_s20  ;;  %v907_v54 = vmul.f32 -1.442695, %v325_v53 }
 0x618   :  { %1074 = vpow2.f32 %v907_v54 }
 0x625   :  { %v1075_v55 = vpop.eup %1074 }
 0x626   :  { %v329_v56 = vadd.f32 1.0, %v1075_v55 }
 0x628   :  { %1076 = vrcp.f32 %v329_v56 }
 0x635   :  { %v1077_v57 = vpop.eup %1076 }
 0x636   :  { %v344_v63 = vsub.f32 1.0, %v1077_v57  ;;  %v350_v6 = vmul.f32 %v1077_v57, %v244_v47 }
 0x688   :  { %v335_v58 = vpop.permute.xlu0 %334 }
 0x689   :  { %v337_v59 = vmul.f32 %v1077_v57, %v335_v58 }
 0x68b   :  { %339 = vrot.lane.b32.xlu1 %v337_v59, %s1112_s20 }
 0x6fd   :  { %v340_v60 = vpop.permute.xlu1 %339 }
 0x6fe   :  { %v342_v61 = vadd.f32 %v905_v52, %v340_v60 }
 0x700   :  { %1078 = vtanh.f32 %v342_v61 }
 0x70d   :  { %v1079_v62 = vpop.eup %1078 }
 0x70e   :  { %346 = vrot.lane.b32.xlu0 %v1079_v62, %s1114_s24 }
 0x780   :  { %v347_v3 = vpop.permute.xlu0 %346 }
 0x781   :  { %v349_v8 = vmul.f32 %v347_v3, %v344_v63 }
 0x783   :  { %v351_v9 = vadd.f32 %v350_v6, %v349_v8 }
 0x785   :  { %353 = vrot.lane.b32.xlu1 %v351_v9, %s1114_s24 }
 0x7f7   :  { %v354_v10 = vpop.permute.xlu1 %353 }
 0x7f8   :  { %908 = vst.msk [vmem:[%s1351_s3 + $0x10] sm:$0xff] %vm18_vm0, %v354_v10  ;;  %1011 = vmatmul.mubr.msk.f32.vlgmr.msra.gmra.mxu1 %vm18_vm0, %v354_v10 }
 0x7f9   :  { %1025 = vmatpush3.msra.mxu1 %v1139_v1  ;;  %1032 = vmatprep.mubr.msk.f32.mxu1 %vm1111_vm1, %v1110_v0 }
 0x7fa   :  { %1026 = vmatprep.subr.mxu1 %v1110_v0 }
 0x7fb   :  { %1027 = vmatpush3.msra.mxu1 %v1144_v2 }
 0x7fc   :  { %1028 = vmatprep.subr.mxu1 %v1110_v0 }
 0x7fd   :  { %1029 = vmatpush3.msra.mxu1 %v1159_v4 }
 0x7fe   :  { %1030 = vmatprep.subr.mxu1 %v1110_v0 }
 0x7ff   :  { %1031 = vmatpush3.msra.mxu1 %v1168_v5 }
 0x800   :  { %1046 = vmatprep.subr.mxu1 %v1110_v0 }
 0x8b8   :  { %v428_v11 = vpop.f32.mrf.mxu1 }
 0x8b9   :  { %v439_v12 = vadd.f32 %v428_v11, %v1194_v7  ;;  %v432_v15 = vadd.f32 %v909_v14, %v428_v11  ;;  %v921_v11 = vld [vmem:[%s1350_s0 + $0x30] sm:$0xff] }
 0x8ba   :  { %v1012_v13 = vpop.f32.mrf.mxu1 }
 0x8bb   :  { %441 = vrot.lane.b32.xlu0 %v439_v12, %s1112_s20  ;;  %v911_v16 = vmul.f32 -1.442695, %v432_v15 }
 0x8bd   :  { %1080 = vpow2.f32 %v911_v16 }
 0x8ca   :  { %v1081_v17 = vpop.eup %1080 }
 0x8cb   :  { %v436_v18 = vadd.f32 1.0, %v1081_v17 }
 0x8cd   :  { %1082 = vrcp.f32 %v436_v18 }
 0x8da   :  { %v1083_v19 = vpop.eup %1082 }
 0x8db   :  { %v451_v25 = vsub.f32 1.0, %v1083_v19  ;;  %v457_v27 = vmul.f32 %v1083_v19, %v351_v9 }
 0x92d   :  { %v442_v20 = vpop.permute.xlu0 %441 }
 0x92e   :  { %v444_v21 = vmul.f32 %v1083_v19, %v442_v20 }
 0x930   :  { %446 = vrot.lane.b32.xlu1 %v444_v21, %s1112_s20 }
 0x9a2   :  { %v447_v22 = vpop.permute.xlu1 %446 }
 0x9a3   :  { %v449_v23 = vadd.f32 %v909_v14, %v447_v22 }
 0x9a5   :  { %1084 = vtanh.f32 %v449_v23 }
 0x9b2   :  { %v1085_v24 = vpop.eup %1084 }
 0x9b3   :  { %453 = vrot.lane.b32.xlu0 %v1085_v24, %s1114_s24 }
 0xa25   :  { %v454_v26 = vpop.permute.xlu0 %453 }
 0xa26   :  { %v456_v28 = vmul.f32 %v454_v26, %v451_v25 }
 0xa28   :  { %v458_v29 = vadd.f32 %v457_v27, %v456_v28 }
 0xa2a   :  { %460 = vrot.lane.b32.xlu1 %v458_v29, %s1114_s24 }
 0xa9c   :  { %v461_v30 = vpop.permute.xlu1 %460 }
 0xa9d   :  { %912 = vst.msk [vmem:[%s1351_s3 + $0x18] sm:$0xff] %vm18_vm0, %v461_v30  ;;  %1022 = vmatmul.mubr.msk.f32.vlgmr.msra.gmra.mxu0 %vm18_vm0, %v461_v30 }
 0xa9e   :  { %1036 = vmatpush3.msra.mxu0 %v1139_v1  ;;  %1043 = vmatprep.mubr.msk.f32.mxu0 %vm1111_vm1, %v1110_v0 }
 0xa9f   :  { %1037 = vmatprep.subr.mxu0 %v1110_v0 }
 0xaa0   :  { %1038 = vmatpush3.msra.mxu0 %v1144_v2 }
 0xaa1   :  { %1039 = vmatprep.subr.mxu0 %v1110_v0 }
 0xaa2   :  { %1040 = vmatpush3.msra.mxu0 %v1159_v4 }
 0xaa3   :  { %1041 = vmatprep.subr.mxu0 %v1110_v0 }
 0xaa4   :  { %1042 = vmatpush3.msra.mxu0 %v1168_v5 }
 0xb5d   :  { %v535_v31 = vpop.f32.mrf.mxu0 }
 0xb5e   :  { %v546_v32 = vadd.f32 %v535_v31, %v1194_v7  ;;  %v539_v35 = vadd.f32 %v913_v34, %v535_v31  ;;  %v925_v31 = vld [vmem:[%s1350_s0 + $0x38] sm:$0xff] }
 0xb5f   :  { %v1023_v33 = vpop.f32.mrf.mxu0 }
 0xb60   :  { %548 = vrot.lane.b32.xlu0 %v546_v32, %s1112_s20  ;;  %v915_v36 = vmul.f32 -1.442695, %v539_v35 }
 0xb62   :  { %1086 = vpow2.f32 %v915_v36 }
 0xb6f   :  { %v1087_v37 = vpop.eup %1086 }
 0xb70   :  { %v543_v38 = vadd.f32 1.0, %v1087_v37 }
 0xb72   :  { %1088 = vrcp.f32 %v543_v38 }
 0xb7f   :  { %v1089_v39 = vpop.eup %1088 }
 0xb80   :  { %v558_v45 = vsub.f32 1.0, %v1089_v39  ;;  %v564_v47 = vmul.f32 %v1089_v39, %v458_v29 }
 0xbd2   :  { %v549_v40 = vpop.permute.xlu0 %548 }
 0xbd3   :  { %v551_v41 = vmul.f32 %v1089_v39, %v549_v40 }
 0xbd5   :  { %553 = vrot.lane.b32.xlu1 %v551_v41, %s1112_s20 }
 0xc47   :  { %v554_v42 = vpop.permute.xlu1 %553 }
 0xc48   :  { %v556_v43 = vadd.f32 %v913_v34, %v554_v42 }
 0xc4a   :  { %1090 = vtanh.f32 %v556_v43 }
 0xc57   :  { %v1091_v44 = vpop.eup %1090 }
 0xc58   :  { %560 = vrot.lane.b32.xlu0 %v1091_v44, %s1114_s24 }
 0xcca   :  { %v561_v46 = vpop.permute.xlu0 %560 }
 0xccb   :  { %v563_v48 = vmul.f32 %v561_v46, %v558_v45 }
 0xccd   :  { %v565_v49 = vadd.f32 %v564_v47, %v563_v48 }
 0xccf   :  { %567 = vrot.lane.b32.xlu1 %v565_v49, %s1114_s24 }
 0xd41   :  { %v568_v50 = vpop.permute.xlu1 %567 }
 0xd42   :  { %916 = vst.msk [vmem:[%s1351_s3 + $0x20] sm:$0xff] %vm18_vm0, %v568_v50  ;;  %1033 = vmatmul.mubr.msk.f32.vlgmr.msra.gmra.mxu1 %vm18_vm0, %v568_v50 }
 0xd43   :  { %1047 = vmatpush3.msra.mxu1 %v1139_v1  ;;  %1054 = vmatprep.mubr.msk.f32.mxu1 %vm1111_vm1, %v1110_v0  ;;  %v917_v1 = vld [vmem:[%s1350_s0 + $0x28] sm:$0xff] }
 0xd44   :  { %1048 = vmatprep.subr.mxu1 %v1110_v0 }
 0xd45   :  { %1049 = vmatpush3.msra.mxu1 %v1144_v2 }
 0xd46   :  { %1050 = vmatprep.subr.mxu1 %v1110_v0 }
 0xd47   :  { %1051 = vmatpush3.msra.mxu1 %v1159_v4 }
 0xd48   :  { %1052 = vmatprep.subr.mxu1 %v1110_v0 }
 0xd49   :  { %1053 = vmatpush3.msra.mxu1 %v1168_v5 }
 0xe02   :  { %v642_v51 = vpop.f32.mrf.mxu1 }
 0xe03   :  { %v653_v52 = vadd.f32 %v642_v51, %v1194_v7  ;;  %v646_v54 = vadd.f32 %v917_v1, %v642_v51 }
 0xe04   :  { %v1034_v53 = vpop.f32.mrf.mxu1 }
 0xe05   :  { %655 = vrot.lane.b32.xlu0 %v653_v52, %s1112_s20  ;;  %v919_v2 = vmul.f32 -1.442695, %v646_v54 }
 0xe07   :  { %1092 = vpow2.f32 %v919_v2 }
 0xe14   :  { %v1093_v55 = vpop.eup %1092 }
 0xe15   :  { %v650_v56 = vadd.f32 1.0, %v1093_v55 }
 0xe17   :  { %1094 = vrcp.f32 %v650_v56 }
 0xe24   :  { %v1095_v4 = vpop.eup %1094 }
 0xe25   :  { %v665_v60 = vsub.f32 1.0, %v1095_v4  ;;  %v671_v62 = vmul.f32 %v1095_v4, %v565_v49 }
 0xe77   :  { %v656_v0 = vpop.permute.xlu0 %655 }
 0xe78   :  { %v658_v57 = vmul.f32 %v1095_v4, %v656_v0 }
 0xe7a   :  { %660 = vrot.lane.b32.xlu1 %v658_v57, %s1112_s20 }
 0xeec   :  { %v661_v5 = vpop.permute.xlu1 %660 }
 0xeed   :  { %v663_v58 = vadd.f32 %v917_v1, %v661_v5 }
 0xeef   :  { %1096 = vtanh.f32 %v663_v58 }
 0xefc   :  { %v1097_v59 = vpop.eup %1096 }
 0xefd   :  { %667 = vrot.lane.b32.xlu0 %v1097_v59, %s1114_s24 }
 0xf6f   :  { %v668_v61 = vpop.permute.xlu0 %667 }
 0xf70   :  { %v670_v63 = vmul.f32 %v668_v61, %v665_v60 }
 0xf72   :  { %v672_v3 = vadd.f32 %v671_v62, %v670_v63 }
 0xf74   :  { %674 = vrot.lane.b32.xlu1 %v672_v3, %s1114_s24 }
 0xfe6   :  { %v675_v6 = vpop.permute.xlu1 %674 }
 0xfe7   :  { %920 = vst.msk [vmem:[%s1351_s3 + $0x28] sm:$0xff] %vm18_vm0, %v675_v6  ;;  %1044 = vmatmul.mubr.msk.f32.vlgmr.msra.gmra.mxu0 %vm18_vm0, %v675_v6 }
0x10a7   :  { %v749_v8 = vpop.f32.mrf.mxu0 }
0x10a8   :  { %v760_v9 = vadd.f32 %v749_v8, %v1194_v7  ;;  %v753_v12 = vadd.f32 %v921_v11, %v749_v8 }
0x10a9   :  { %v1045_v10 = vpop.f32.mrf.mxu0 }
0x10aa   :  { %762 = vrot.lane.b32.xlu0 %v760_v9, %s1112_s20  ;;  %v923_v13 = vmul.f32 -1.442695, %v753_v12 }
0x10ac   :  { %1098 = vpow2.f32 %v923_v13 }
0x10b9   :  { %v1099_v14 = vpop.eup %1098 }
0x10ba   :  { %v757_v15 = vadd.f32 1.0, %v1099_v14 }
0x10bc   :  { %1100 = vrcp.f32 %v757_v15 }
0x10c9   :  { %v1101_v16 = vpop.eup %1100 }
0x10ca   :  { %v772_v22 = vsub.f32 1.0, %v1101_v16  ;;  %v778_v24 = vmul.f32 %v1101_v16, %v672_v3 }
0x111c   :  { %v763_v17 = vpop.permute.xlu0 %762 }
0x111d   :  { %v765_v18 = vmul.f32 %v1101_v16, %v763_v17 }
0x111f   :  { %767 = vrot.lane.b32.xlu1 %v765_v18, %s1112_s20 }
0x1191   :  { %v768_v19 = vpop.permute.xlu1 %767 }
0x1192   :  { %v770_v20 = vadd.f32 %v921_v11, %v768_v19 }
0x1194   :  { %1102 = vtanh.f32 %v770_v20 }
0x11a1   :  { %v1103_v21 = vpop.eup %1102 }
0x11a2   :  { %774 = vrot.lane.b32.xlu0 %v1103_v21, %s1114_s24 }
0x1214   :  { %v775_v23 = vpop.permute.xlu0 %774 }
0x1215   :  { %v777_v25 = vmul.f32 %v775_v23, %v772_v22 }
0x1217   :  { %v779_v26 = vadd.f32 %v778_v24, %v777_v25 }
0x1219   :  { %781 = vrot.lane.b32.xlu1 %v779_v26, %s1114_s24 }
0x128b   :  { %v782_v27 = vpop.permute.xlu1 %781 }
0x128c   :  { %924 = vst.msk [vmem:[%s1351_s3 + $0x30] sm:$0xff] %vm18_vm0, %v782_v27  ;;  %1055 = vmatmul.mubr.msk.f32.vlgmr.msra.gmra.mxu1 %vm18_vm0, %v782_v27 }
0x134c   :  { %v856_v28 = vpop.f32.mrf.mxu1 }
0x134d   :  { %v867_v29 = vadd.f32 %v856_v28, %v1194_v7  ;;  %v860_v32 = vadd.f32 %v925_v31, %v856_v28 }
0x134e   :  { %v1056_v30 = vpop.f32.mrf.mxu1 }
0x134f   :  { %869 = vrot.lane.b32.xlu0 %v867_v29, %s1112_s20  ;;  %v927_v33 = vmul.f32 -1.442695, %v860_v32 }
0x1351   :  { %1104 = vpow2.f32 %v927_v33 }
0x135e   :  { %v1105_v34 = vpop.eup %1104 }
0x135f   :  { %v864_v35 = vadd.f32 1.0, %v1105_v34 }
0x1361   :  { %1106 = vrcp.f32 %v864_v35 }
0x136e   :  { %v1107_v36 = vpop.eup %1106 }
0x136f   :  { %v879_v41 = vsub.f32 1.0, %v1107_v36  ;;  %v885_v43 = vmul.f32 %v1107_v36, %v779_v26 }
0x13c1   :  { %v870_v37 = vpop.permute.xlu0 %869 }
0x13c2   :  { %v872_v38 = vmul.f32 %v1107_v36, %v870_v37 }
0x13c4   :  { %874 = vrot.lane.b32.xlu1 %v872_v38, %s1112_s20 }
0x1436   :  { %v875_v39 = vpop.permute.xlu1 %874 }
0x1437   :  { %v877_v7 = vadd.f32 %v925_v31, %v875_v39 }
0x1439   :  { %1108 = vtanh.f32 %v877_v7 }
0x1446   :  { %v1109_v40 = vpop.eup %1108 }
0x1447   :  { %881 = vrot.lane.b32.xlu0 %v1109_v40, %s1114_s24 }
0x14b9   :  { %v882_v42 = vpop.permute.xlu0 %881 }
0x14ba   :  { %v884_v44 = vmul.f32 %v882_v42, %v879_v41 }
0x14bc   :  { %v886_v45 = vadd.f32 %v885_v43, %v884_v44 }
0x14be   :  { %888 = vrot.lane.b32.xlu1 %v886_v45, %s1114_s24 }
0x1530   :  { %v889_v46 = vpop.permute.xlu1 %888 }
0x1531   :  { %928 = vst.msk [vmem:[%s1351_s3 + $0x38] sm:$0xff] %vm18_vm0, %v889_v46  ;;  %893 = vst.msk [vmem:[#allocation2] sm:$0xff] %vm18_vm0, %v889_v46 }

</bundles_post_ra>
